<compile_context>
chip_gen: v5e
topology: v5e:2x2
jax: 0.10.0
libtpu: 0.0.40
codegen_flags: <defaults>
</compile_context>

<pallas_src>
import math
from functools import partial

import numpy as np
import jax
import jax.numpy as jnp
from jax import lax
from jax.experimental import pallas as pl
from jax.experimental.pallas import tpu as pltpu


def _pool_params(dim, s):
    """Replicates the PyTorch module's kernel / padding / output-size math."""
    k = int(math.ceil(dim / s))              # h_wid / w_wid / t_wid
    p = int((k * s - dim + 1) / 2)           # h_pad / w_pad / t_pad
    o = (dim + 2 * p - k) // k + 1           # MaxPool3d output size (stride == k)
    return k, p, o


def _window(i, k, p, dim):
    """Clipped [lo, hi) extent of output window i (pad < kernel => never empty)."""
    lo = max(i * k - p, 0)
    hi = min(i * k - p + k, dim)
    return lo, hi


def _build_masks(H, W, T, scale_list):
    """Per-scale (P_s, H*W*T) 0/1 window-membership masks (host, numpy)."""
    masks, P_list = [], []
    for s in scale_list:
        kh, ph, oh = _pool_params(H, s)
        kw, pw, ow = _pool_params(W, s)
        kt, pt, ot = _pool_params(T, s)
        assert ph < kh and pw < kw and pt < kt, "MaxPool3d requires pad < kernel"
        P = oh * ow * ot
        m = np.zeros((P, H * W * T), dtype=np.float32)
        for i in range(oh):
            hs, he = _window(i, kh, ph, H)
            for j in range(ow):
                ws, we = _window(j, kw, pw, W)
                for l in range(ot):
                    ts, te = _window(l, kt, pt, T)
                    p = (i * ow + j) * ot + l          # PyTorch (oh, ow, ot) order
                    for h in range(hs, he):
                        for w in range(ws, we):
                            m[p, (h * W + w) * T + ts:(h * W + w) * T + te] = 1.0
        masks.append(m)
        P_list.append(P)
    return masks, P_list


def _pick_bblk(B, C, HWT, P_list):
    """Batch elements per grid step, sized for VMEM and v7x's two TensorCores."""
    in_bytes = 4 * C * HWT                      # one f32 batch element
    bcast_bytes = 4 * C * max(P_list) * HWT     # largest broadcast intermediate
    out_bytes = 4 * C * sum(P_list)
    per_elem = 2 * in_bytes + bcast_bytes + 2 * out_bytes
    budget = 8 * 1024 * 1024                    # well under v5e's 16 MiB default scope
    bblk = max(1, min(B, budget // max(per_elem, 1)))
    if B >= 2:
        bblk = min(bblk, -(-B // 2))            # keep >= 2 grid steps (v7x: 2 TCs)
    return bblk


def _make_spp_kernel(n_scales):
    """Kernel: Bblk batch elements -> one (Bblk, C, P_s) max-pool tile per scale."""

    def kernel(*refs):
        x_ref = refs[0]
        mask_refs = refs[1:1 + n_scales]
        out_refs = refs[1 + n_scales:]
        x = x_ref[...]                                      # (Bblk, C, HWT)
        for m_ref, o_ref in zip(mask_refs, out_refs):
            cond = m_ref[...] > 0.5                         # (P, HWT)
            # Stacked masked reduce: one select + one lane-axis max per scale.
            z = jnp.where(cond[None, None, :, :],           # (Bblk, C, P, HWT)
                          x[:, :, None, :], -jnp.inf)
            o_ref[...] = jnp.max(z, axis=-1).astype(o_ref.dtype)

    return kernel


@partial(jax.jit, static_argnums=1)
def spp3d_old(x, scale_list):
    """x: (B, C, H, W, T) exactly like the PyTorch module.

    Returns (B, sum_s C*oh_s*ow_s*ot_s), same flatten/concat order as PyTorch."""
    B, C, H, W, T = x.shape
    HWT = H * W * T
    masks_np, P_list = _build_masks(H, W, T, scale_list)
    masks = [jnp.asarray(m) for m in masks_np]
    bblk = _pick_bblk(B, C, HWT, P_list)
    grid = (pl.cdiv(B, bblk),)

    x2 = x.reshape(B, C, HWT)                    # free row-major merge, no transpose

    in_specs = [pl.BlockSpec((bblk, C, HWT), lambda b: (b, 0, 0))]
    in_specs += [pl.BlockSpec((P, HWT), lambda b: (0, 0)) for P in P_list]
    out_specs = [pl.BlockSpec((bblk, C, P), lambda b: (b, 0, 0)) for P in P_list]
    out_shape = tuple(jax.ShapeDtypeStruct((B, C, P), x.dtype) for P in P_list)

    outs = pl.pallas_call(
        _make_spp_kernel(len(scale_list)),
        out_shape=out_shape,
        grid=grid,
        in_specs=in_specs,
        out_specs=out_specs,
        compiler_params=pltpu.CompilerParams(dimension_semantics=("parallel",)),
    )(x2, *masks)

    # PyTorch order: per scale flatten (C, oh, ow, ot) C-major, then concat scales.
    return jnp.concatenate([o.reshape(B, -1) for o in outs], axis=1)


def spp3d_ref(x, scale_list):
    """Pure-JAX reference (lax.reduce_window) mirroring nn.MaxPool3d semantics."""
    B, C, H, W, T = x.shape
    outs = []
    for s in scale_list:
        kh, ph, _ = _pool_params(H, s)
        kw, pw, _ = _pool_params(W, s)
        kt, pt, _ = _pool_params(T, s)
        o = lax.reduce_window(
            x, -jnp.inf, lax.max,
            window_dimensions=(1, 1, kh, kw, kt),
            window_strides=(1, 1, kh, kw, kt),
            padding=((0, 0), (0, 0), (ph, ph), (pw, pw), (pt, pt)))
        outs.append(o.reshape(B, -1))
    return jnp.concatenate(outs, axis=1)


if __name__ == "__main__":
    key = jax.random.PRNGKey(0)
    B, C, H, W, T = 2, 4, 8, 8, 8
    scale_list = (1, 2, 3, 4)  # scale 3 exercises the padded / clipped-window path
    x = jax.random.normal(key, (B, C, H, W, T), dtype=jnp.float32)

    out = jax.block_until_ready(spp3d_old(x, scale_list))
    ref = jax.block_until_ready(spp3d_ref(x, scale_list))

    expected_feat = C * sum(
        _pool_params(H, s)[2] * _pool_params(W, s)[2] * _pool_params(T, s)[2]
        for s in scale_list)
    assert out.shape == (B, expected_feat), out.shape
    assert jnp.allclose(out, ref, atol=0.0, rtol=0.0), float(jnp.max(jnp.abs(out - ref)))
    print("KERNEL_OK")
</pallas_src>

<mosaic_0001>
module attributes {stable_mosaic.version = 11 : i64} {
  func.func @kernel(%arg0: i32, %arg1: memref<1x4x512xf32, #tpu.memory_space<vmem>>, %arg2: memref<1x512xf32, #tpu.memory_space<vmem>>, %arg3: memref<8x512xf32, #tpu.memory_space<vmem>>, %arg4: memref<27x512xf32, #tpu.memory_space<vmem>>, %arg5: memref<64x512xf32, #tpu.memory_space<vmem>>, %arg6: memref<1x4x1xf32, #tpu.memory_space<vmem>>, %arg7: memref<1x4x8xf32, #tpu.memory_space<vmem>>, %arg8: memref<1x4x27xf32, #tpu.memory_space<vmem>>, %arg9: memref<1x4x64xf32, #tpu.memory_space<vmem>>) attributes {dimension_semantics = [#tpu.dimension_semantics<parallel>], iteration_bounds = array<i64: 2>, scalar_prefetch = 0 : i64, scratch_operands = 0 : i64, tpu.core_type = #tpu.core_type<tc>, window_params = [{transform_indices = @transform_0, window_bounds = array<i64: 1, 4, 512>}, {pipeline_mode = #tpu.pipeline_mode<synchronous>, transform_indices = @transform_1, window_bounds = array<i64: 1, 512>}, {pipeline_mode = #tpu.pipeline_mode<synchronous>, transform_indices = @transform_2, window_bounds = array<i64: 8, 512>}, {pipeline_mode = #tpu.pipeline_mode<synchronous>, transform_indices = @transform_3, window_bounds = array<i64: 27, 512>}, {pipeline_mode = #tpu.pipeline_mode<synchronous>, transform_indices = @transform_4, window_bounds = array<i64: 64, 512>}, {transform_indices = @transform_5, window_bounds = array<i64: 1, 4, 1>}, {transform_indices = @transform_6, window_bounds = array<i64: 1, 4, 8>}, {transform_indices = @transform_7, window_bounds = array<i64: 1, 4, 27>}, {transform_indices = @transform_8, window_bounds = array<i64: 1, 4, 64>}]} {
    %c0 = arith.constant 0 : index
    %c0_0 = arith.constant 0 : index
    %c0_1 = arith.constant 0 : index
    %0 = vector.load %arg1[%c0, %c0_0, %c0_1] : memref<1x4x512xf32, #tpu.memory_space<vmem>>, vector<1x4x512xf32>
    %c0_2 = arith.constant 0 : index
    %c0_3 = arith.constant 0 : index
    %1 = vector.load %arg2[%c0_2, %c0_3] : memref<1x512xf32, #tpu.memory_space<vmem>>, vector<1x512xf32>
    %cst = arith.constant 5.000000e-01 : f32
    %2 = vector.broadcast %cst : f32 to vector<1x512xf32>
    %3 = arith.cmpf ogt, %1, %2 : vector<1x512xf32>
    %4 = vector.shape_cast %3 : vector<1x512xi1> to vector<1x1x1x512xi1>
    %5 = vector.shape_cast %0 : vector<1x4x512xf32> to vector<1x4x1x512xf32>
    %cst_4 = arith.constant 0xFF800000 : f32
    %6 = vector.shape_cast %4 : vector<1x1x1x512xi1> to vector<1x1x1x512xi1>
    %7 = vector.broadcast %6 : vector<1x1x1x512xi1> to vector<1x4x1x512xi1>
    %8 = vector.broadcast %cst_4 : f32 to vector<1x4x1x512xf32>
    %9 = arith.select %7, %5, %8 : vector<1x4x1x512xi1>, vector<1x4x1x512xf32>
    %cst_5 = arith.constant dense<0xFF800000> : vector<1x4x1xf32>
    %10 = vector.multi_reduction <maximumf>, %9, %cst_5 [3] : vector<1x4x1x512xf32> to vector<1x4x1xf32>
    %c0_6 = arith.constant 0 : index
    %c0_7 = arith.constant 0 : index
    %c0_8 = arith.constant 0 : index
    %11 = vector.load %arg6[%c0_6, %c0_7, %c0_8] : memref<1x4x1xf32, #tpu.memory_space<vmem>>, vector<1x4x1xf32>
    tpu.vector_store %arg6[%c0_6, %c0_7, %c0_8], %10 {strides = array<i32>} : memref<1x4x1xf32, #tpu.memory_space<vmem>>, vector<1x4x1xf32>,
    %c0_9 = arith.constant 0 : index
    %c0_10 = arith.constant 0 : index
    %12 = vector.load %arg3[%c0_9, %c0_10] : memref<8x512xf32, #tpu.memory_space<vmem>>, vector<8x512xf32>
    %cst_11 = arith.constant 5.000000e-01 : f32
    %13 = vector.broadcast %cst_11 : f32 to vector<8x512xf32>
    %14 = arith.cmpf ogt, %12, %13 : vector<8x512xf32>
    %15 = vector.shape_cast %14 : vector<8x512xi1> to vector<1x1x8x512xi1>
    %16 = vector.shape_cast %0 : vector<1x4x512xf32> to vector<1x4x1x512xf32>
    %cst_12 = arith.constant 0xFF800000 : f32
    %17 = vector.shape_cast %15 : vector<1x1x8x512xi1> to vector<1x1x8x512xi1>
    %18 = vector.broadcast %17 : vector<1x1x8x512xi1> to vector<1x4x8x512xi1>
    %19 = vector.shape_cast %16 : vector<1x4x1x512xf32> to vector<1x4x1x512xf32>
    %20 = vector.broadcast %19 : vector<1x4x1x512xf32> to vector<1x4x8x512xf32>
    %21 = vector.broadcast %cst_12 : f32 to vector<1x4x8x512xf32>
    %22 = arith.select %18, %20, %21 : vector<1x4x8x512xi1>, vector<1x4x8x512xf32>
    %cst_13 = arith.constant dense<0xFF800000> : vector<1x4x8xf32>
    %23 = vector.multi_reduction <maximumf>, %22, %cst_13 [3] : vector<1x4x8x512xf32> to vector<1x4x8xf32>
    %c0_14 = arith.constant 0 : index
    %c0_15 = arith.constant 0 : index
    %c0_16 = arith.constant 0 : index
    %24 = vector.load %arg7[%c0_14, %c0_15, %c0_16] : memref<1x4x8xf32, #tpu.memory_space<vmem>>, vector<1x4x8xf32>
    tpu.vector_store %arg7[%c0_14, %c0_15, %c0_16], %23 {strides = array<i32>} : memref<1x4x8xf32, #tpu.memory_space<vmem>>, vector<1x4x8xf32>,
    %c0_17 = arith.constant 0 : index
    %c0_18 = arith.constant 0 : index
    %25 = vector.load %arg4[%c0_17, %c0_18] : memref<27x512xf32, #tpu.memory_space<vmem>>, vector<27x512xf32>
    %cst_19 = arith.constant 5.000000e-01 : f32
    %26 = vector.broadcast %cst_19 : f32 to vector<27x512xf32>
    %27 = arith.cmpf ogt, %25, %26 : vector<27x512xf32>
    %28 = vector.shape_cast %27 : vector<27x512xi1> to vector<1x1x27x512xi1>
    %29 = vector.shape_cast %0 : vector<1x4x512xf32> to vector<1x4x1x512xf32>
    %cst_20 = arith.constant 0xFF800000 : f32
    %30 = vector.shape_cast %28 : vector<1x1x27x512xi1> to vector<1x1x27x512xi1>
    %31 = vector.broadcast %30 : vector<1x1x27x512xi1> to vector<1x4x27x512xi1>
    %32 = vector.shape_cast %29 : vector<1x4x1x512xf32> to vector<1x4x1x512xf32>
    %33 = vector.broadcast %32 : vector<1x4x1x512xf32> to vector<1x4x27x512xf32>
    %34 = vector.broadcast %cst_20 : f32 to vector<1x4x27x512xf32>
    %35 = arith.select %31, %33, %34 : vector<1x4x27x512xi1>, vector<1x4x27x512xf32>
    %cst_21 = arith.constant dense<0xFF800000> : vector<1x4x27xf32>
    %36 = vector.multi_reduction <maximumf>, %35, %cst_21 [3] : vector<1x4x27x512xf32> to vector<1x4x27xf32>
    %c0_22 = arith.constant 0 : index
    %c0_23 = arith.constant 0 : index
    %c0_24 = arith.constant 0 : index
    %37 = vector.load %arg8[%c0_22, %c0_23, %c0_24] : memref<1x4x27xf32, #tpu.memory_space<vmem>>, vector<1x4x27xf32>
    tpu.vector_store %arg8[%c0_22, %c0_23, %c0_24], %36 {strides = array<i32>} : memref<1x4x27xf32, #tpu.memory_space<vmem>>, vector<1x4x27xf32>,
    %c0_25 = arith.constant 0 : index
    %c0_26 = arith.constant 0 : index
    %38 = vector.load %arg5[%c0_25, %c0_26] : memref<64x512xf32, #tpu.memory_space<vmem>>, vector<64x512xf32>
    %cst_27 = arith.constant 5.000000e-01 : f32
    %39 = vector.broadcast %cst_27 : f32 to vector<64x512xf32>
    %40 = arith.cmpf ogt, %38, %39 : vector<64x512xf32>
    %41 = vector.shape_cast %40 : vector<64x512xi1> to vector<1x1x64x512xi1>
    %42 = vector.shape_cast %0 : vector<1x4x512xf32> to vector<1x4x1x512xf32>
    %cst_28 = arith.constant 0xFF800000 : f32
    %43 = vector.shape_cast %41 : vector<1x1x64x512xi1> to vector<1x1x64x512xi1>
    %44 = vector.broadcast %43 : vector<1x1x64x512xi1> to vector<1x4x64x512xi1>
    %45 = vector.shape_cast %42 : vector<1x4x1x512xf32> to vector<1x4x1x512xf32>
    %46 = vector.broadcast %45 : vector<1x4x1x512xf32> to vector<1x4x64x512xf32>
    %47 = vector.broadcast %cst_28 : f32 to vector<1x4x64x512xf32>
    %48 = arith.select %44, %46, %47 : vector<1x4x64x512xi1>, vector<1x4x64x512xf32>
    %cst_29 = arith.constant dense<0xFF800000> : vector<1x4x64xf32>
    %49 = vector.multi_reduction <maximumf>, %48, %cst_29 [3] : vector<1x4x64x512xf32> to vector<1x4x64xf32>
    %c0_30 = arith.constant 0 : index
    %c0_31 = arith.constant 0 : index
    %c0_32 = arith.constant 0 : index
    %50 = vector.load %arg9[%c0_30, %c0_31, %c0_32] : memref<1x4x64xf32, #tpu.memory_space<vmem>>, vector<1x4x64xf32>
    tpu.vector_store %arg9[%c0_30, %c0_31, %c0_32], %49 {strides = array<i32>} : memref<1x4x64xf32, #tpu.memory_space<vmem>>, vector<1x4x64xf32>,
    return
  }
  func.func @transform_0(%arg0: i32) -> (i32, i32, i32) {
    %c0_i32 = arith.constant 0 : i32
    %c0_i32_0 = arith.constant 0 : i32
    %c0_i32_1 = arith.constant 0 : i32
    return %arg0, %c0_i32, %c0_i32_0 : i32, i32, i32
  }
  func.func @transform_1(%arg0: i32) -> (i32, i32) {
    %c0_i32 = arith.constant 0 : i32
    %c0_i32_0 = arith.constant 0 : i32
    %c0_i32_1 = arith.constant 0 : i32
    return %c0_i32, %c0_i32_0 : i32, i32
  }
  func.func @transform_2(%arg0: i32) -> (i32, i32) {
    %c0_i32 = arith.constant 0 : i32
    %c0_i32_0 = arith.constant 0 : i32
    %c0_i32_1 = arith.constant 0 : i32
    return %c0_i32, %c0_i32_0 : i32, i32
  }
  func.func @transform_3(%arg0: i32) -> (i32, i32) {
    %c0_i32 = arith.constant 0 : i32
    %c0_i32_0 = arith.constant 0 : i32
    %c0_i32_1 = arith.constant 0 : i32
    return %c0_i32, %c0_i32_0 : i32, i32
  }
  func.func @transform_4(%arg0: i32) -> (i32, i32) {
    %c0_i32 = arith.constant 0 : i32
    %c0_i32_0 = arith.constant 0 : i32
    %c0_i32_1 = arith.constant 0 : i32
    return %c0_i32, %c0_i32_0 : i32, i32
  }
  func.func @transform_5(%arg0: i32) -> (i32, i32, i32) {
    %c0_i32 = arith.constant 0 : i32
    %c0_i32_0 = arith.constant 0 : i32
    %c0_i32_1 = arith.constant 0 : i32
    return %arg0, %c0_i32, %c0_i32_0 : i32, i32, i32
  }
  func.func @transform_6(%arg0: i32) -> (i32, i32, i32) {
    %c0_i32 = arith.constant 0 : i32
    %c0_i32_0 = arith.constant 0 : i32
    %c0_i32_1 = arith.constant 0 : i32
    return %arg0, %c0_i32, %c0_i32_0 : i32, i32, i32
  }
  func.func @transform_7(%arg0: i32) -> (i32, i32, i32) {
    %c0_i32 = arith.constant 0 : i32
    %c0_i32_0 = arith.constant 0 : i32
    %c0_i32_1 = arith.constant 0 : i32
    return %arg0, %c0_i32, %c0_i32_0 : i32, i32, i32
  }
  func.func @transform_8(%arg0: i32) -> (i32, i32, i32) {
    %c0_i32 = arith.constant 0 : i32
    %c0_i32_0 = arith.constant 0 : i32
    %c0_i32_1 = arith.constant 0 : i32
    return %arg0, %c0_i32, %c0_i32_0 : i32, i32, i32
  }
}

</mosaic_0001>

<bundles_post_ra>
// kernel: spp3d_old.1
= control target key start
LH: loop header
LB: loop body
LE: loop exit
PB: predicated region body
PF: predicated region fallthrough
CT: control target
= control target key end

     0   :  { %s1588_s27 = smov 0   ;;  %s2814_s0 = inlined_call_operand.vmem [shape: f32[2,4,512], index: 0, kind: input, shape index: {}]   ;;  %s2815_s1 = inlined_call_operand.vmem [shape: f32[1,512], index: 1, kind: input, shape index: {}]   ;;  %s2816_s2 = inlined_call_operand.vmem [shape: f32[8,512], index: 2, kind: input, shape index: {}]   ;;  %s2817_s3 = inlined_call_operand.vmem [shape: f32[27,512], index: 3, kind: input, shape index: {}]   ;;  %s2818_s4 = inlined_call_operand.vmem [shape: f32[64,512], index: 4, kind: input, shape index: {}]   ;;  %s2819_s5 = inlined_call_operand.vmem [shape: f32[2,4,1], index: 5, kind: output, shape index: {0}]   ;;  %s2820_s6 = inlined_call_operand.vmem [shape: f32[2,4,8], index: 6, kind: output, shape index: {1}]   ;;  %s2821_s7 = inlined_call_operand.vmem [shape: f32[2,4,27], index: 7, kind: output, shape index: {2}]   ;;  %s2822_s8 = inlined_call_operand.vmem [shape: f32[2,4,64], index: 8, kind: output, shape index: {3}]  }
   0x1 LB: > { %s1513_s28 = sadd.s32 4294967295, %s1541_s27   ;;  %p1517_p0 = scmp.ge.s32.totalorder %s1541_s27, 1  ;;  %s1541_s27 = sphi %s1588_s27, %s19_s27  }
   0x2   : > { %p269_p1 = scmp.lt.s32.totalorder %s1541_s27, 3 }
   0x4   : > { %p270_p2 = pnand %p1517_p0, %p269_p1 }
   0x5   : > { %p314_p3 = scmp.lt.s32.totalorder (!%p270_p2), %s1513_s28, 1 }
   0x6   : > { %273 = sbr.rel (%p270_p2) target bundleno = 302 (0x12e), region = 40 }
   0xb   : > { %v1599_v0 = vld [vmem:[%s2816_s2] sm:$0xff]  ;;  %v1604_v1 = vld [vmem:[%s2816_s2 + $0x8] sm:$0xff]  ;;  %s2929_s28 = smov (!%p314_p3, %s1513_s28), 1  ;;  %v1611_v2 = vld [vmem:[%s2816_s2 + $0x10] sm:$0xff]  ;;  %vm344_vm0 = vcmask 1040384   ;;  %vm2824_vm1 = vcmask 1042434  }
   0xc   : > { %v1616_v3 = vld [vmem:[%s2816_s2 + $0x18] sm:$0xff]  ;;  %v1621_v4 = vld [vmem:[%s2815_s1] sm:$0xf]  ;;  %s1526_s17 = sshll.u32 %s2929_s28, 4  ;;  %vm348_vm2 = vcmask 1041408   ;;  %vm468_vm3 = vcmp.gt.f32.partialorder %v1599_v0, 0.5 }
   0xd   : > { %vm469_vm4 = vcmp.gt.f32.partialorder %v1604_v1, 0.5  ;;  %s318_s20 = scalar_lea.vmem %s2814_s0, %s1526_s17  ;;  %vm338_vm7 = vcmp.gt.f32.partialorder %v1621_v4, 0.5  ;;  %v1635_v5 = vld [vmem:[%s2817_s3] sm:$0xff]  ;;  %v1640_v6 = vld [vmem:[%s2817_s3 + $0x8] sm:$0xff]  ;;  %v1645_v7 = vld [vmem:[%s2817_s3 + $0x10] sm:$0xff]  ;;  %vm2823_vm8 = vcmask 1043459  }
   0xe   : > { %v335_v8 = vld [vmem:[%s318_s20] sm:$0xff]  ;;  %v336_v9 = vld [vmem:[%s318_s20 + $0x8] sm:$0xff]  ;;  %vm364_vm9 = vcmask 1045509   ;;  %vm366_vm10 = vcmask 1044483   ;;  %v1650_v10 = vld [vmem:[%s2817_s3 + $0x18] sm:$0xff]  ;;  %vm358_vm11 = vcmask 1044484  }
   0xf   : > { %v341_v11 = vrot.slane %v335_v8, 3  ;;  %v342_v12 = vrot.slane %v336_v9, 6  ;;  %v343_v13 = vrot.slane %v336_v9, 1  ;;  %vm580_vm12 = vcmp.gt.f32.partialorder %v1635_v5, 0.5  ;;  %s2656_s17 = sshll.u32 %s2929_s28, 2 }
  0x10   : > { %vm581_vm13 = vcmp.gt.f32.partialorder %v1640_v6, 0.5  ;;  %vm360_vm14 = vcmask 1043458   ;;  %vm2825_vm15 = vcmask 1041409   ;;  %vm582_vm6 = vcmp.gt.f32.partialorder %v1645_v7, 0.5  ;;  %s326_s19 = scalar_lea.vmem %s2820_s6, %s2656_s17  ;;  %s322_s22 = scalar_lea.vmem %s2819_s5, %s2656_s17 }
  0x11   : > { %v345_v14 = vsel %vm344_vm0, %v335_v8, %v341_v11  ;;  %v347_v15 = vsel %vm2824_vm1, %v342_v12, %v343_v13  ;;  %v363_v16 = vsel %vm2823_vm8, %v335_v8, %v341_v11  ;;  %v365_v17 = vsel %vm364_vm9, %v342_v12, %v343_v13  ;;  %s330_s25 = scalar_lea.vmem %s2821_s7, %s2656_s17  ;;  %s334_s30 = scalar_lea.vmem %s2822_s8, %s2656_s17 }
  0x12   : > { %vm583_vm5 = vcmp.gt.f32.partialorder %v1650_v10, 0.5  ;;  %v349_v18 = vsel %vm348_vm2, %v345_v14, %v347_v15  ;;  %v367_v19 = vsel %vm366_vm10, %v363_v16, %v365_v17  ;;  %v357_v20 = vsel %vm2824_vm1, %v335_v8, %v341_v11 }
  0x13   : > { %v359_v21 = vsel %vm358_vm11, %v342_v12, %v343_v13  ;;  %v1662_v22 = vperm.slane %v349_v18, 0  ;;  %v1664_v23 = vperm.slane %v349_v18, 1  ;;  %v1666_v24 = vperm.slane %v349_v18, 2 }
  0x14   : > { %v1668_v25 = vperm.slane %v349_v18, 3  ;;  %v375_v26 = vsel %vm338_vm7, %v349_v18, -inf  ;;  %v368_v27 = vrot.slane %v367_v19, 3  ;;  %v361_v28 = vsel %vm360_vm14, %v357_v20, %v359_v21  ;;  %v1746_v20 = vld [vmem:[%s2817_s3 + $0x68] sm:$0x7] }
  0x15   : > { %v351_v29 = vsel %vm2825_vm15, %v335_v8, %v341_v11  ;;  %vm354_vm2 = vcmask 1042433   ;;  %v512_v30 = vsel %vm468_vm3, %v1662_v22, -inf  ;;  %v513_v31 = vsel %vm469_vm4, %v1664_v23, -inf }
  0x16   : > { %vm2849_vm9 = vcmp.gt.f32.partialorder %v1611_v2, 0.5  ;;  %vm2850_vm10 = vcmp.gt.f32.partialorder %v1616_v3, 0.5  ;;  %v528_v34 = vmax.f32 %v512_v30, %v513_v31  ;;  %v383_v35 = vperm.slane %v375_v26, 0  ;;  %v1802_v3 = vld [vmem:[%s2817_s3 + $0x78] sm:$0x7] }
  0x17   : > { %v514_v32 = vsel %vm2849_vm9, %v1666_v24, -inf  ;;  %v515_v33 = vsel %vm2850_vm10, %v1668_v25, -inf  ;;  %v384_v36 = vperm.slane %v375_v26, 1  ;;  %v385_v37 = vperm.slane %v375_v26, 2  ;;  %vm2851_vm11 = vmmov %vm2849_vm9 }
  0x18   : > { %v386_v38 = vperm.slane %v375_v26, 3  ;;  %v1686_v39 = vperm.slane %v368_v27, 0  ;;  %v1688_v40 = vperm.slane %v368_v27, 1  ;;  %v1690_v41 = vperm.slane %v368_v27, 2  ;;  %vm2852_vm14 = vmmov %vm2850_vm10 }
  0x19   : > { %v529_v42 = vmax.f32 %v528_v34, %v514_v32  ;;  %v415_v43 = vsel %vm344_vm0, %v383_v35, -inf  ;;  %v416_v44 = vsel %vm344_vm0, %v384_v36, -inf  ;;  %v418_v45 = vsel %vm344_vm0, %v385_v37, -inf }
  0x1a   : > { %v417_v46 = vmax.f32 %v415_v43, %v416_v44  ;;  %v420_v47 = vsel %vm344_vm0, %v386_v38, -inf  ;;  %v1696_v48 = vperm.slane %v368_v27, 3  ;;  %v524_v49 = vsel %vm468_vm3, %v1686_v39, -inf }
  0x1b   : > { %v530_v50 = vmax.f32 %v529_v42, %v515_v33  ;;  %v525_v51 = vsel %vm469_vm4, %v1688_v40, -inf  ;;  %v526_v52 = vsel %vm2851_vm11, %v1690_v41, -inf  ;;  %v628_v53 = vsel %vm580_vm12, %v1662_v22, -inf }
  0x1c   : > { %v419_v54 = vmax.f32 %v417_v46, %v418_v45  ;;  %v527_v55 = vsel %vm2852_vm14, %v1696_v48, -inf  ;;  %v543_v56 = vmax.f32 %v524_v49, %v525_v51  ;;  %v629_v57 = vsel %vm581_vm13, %v1664_v23, -inf }
  0x1d   : > { %531 = vmax.xlane.f32.xlu2 %v530_v50  ;;  %v630_v58 = vsel %vm582_vm6, %v1666_v24, -inf  ;;  %v631_v59 = vsel %vm583_vm5, %v1668_v25, -inf  ;;  %v692_v60 = vmax.f32 %v628_v53, %v629_v57  ;;  %v362_v61 = vrot.slane %v361_v28, 2 }
  0x1e   : > { %v421_v62 = vmax.f32 %v419_v54, %v420_v47  ;;  %v544_v63 = vmax.f32 %v543_v56, %v526_v52  ;;  %v353_v8 = vsel %vm2823_vm8, %v342_v12, %v343_v13  ;;  %v1725_v9 = vsel %vm338_vm7, %v368_v27, -inf  ;;  %v1741_v13 = vld [vmem:[%s2817_s3 + $0x60] sm:$0x7] }
  0x1f   : > { %v693_v11 = vmax.f32 %v692_v60, %v630_v58  ;;  %v1727_v14 = vperm.slane %v362_v61, 0  ;;  %v1729_v15 = vperm.slane %v362_v61, 1  ;;  %v1731_v16 = vperm.slane %v362_v61, 2 }
  0x20   : > { %422 = vmax.xlane.f32.xlu0 %v421_v62  ;;  %v545_v17 = vmax.f32 %v544_v63, %v527_v55  ;;  %v1733_v18 = vperm.slane %v362_v61, 3  ;;  %v377_v19 = vsel %vm338_vm7, %v362_v61, -inf  ;;  %v355_v12 = vsel %vm354_vm2, %v351_v29, %v353_v8  ;;  %vm2853_vm2 = vmmov %vm2849_vm9  ;;  %v1794_v63 = vld [vmem:[%s2817_s3 + $0x70] sm:$0x7] }
  0x21   : > { %v694_v21 = vmax.f32 %v693_v11, %v631_v59  ;;  %v520_v26 = vsel %vm468_vm3, %v1727_v14, -inf  ;;  %v521_v27 = vsel %vm469_vm4, %v1729_v15, -inf  ;;  %v522_v28 = vsel %vm2853_vm2, %v1731_v16, -inf  ;;  %vm2854_vm9 = vmmov %vm2850_vm10 }
  0x22   : > { %546 = vmax.xlane.f32.xlu1 %v545_v17  ;;  %v523_v29 = vsel %vm2854_vm9, %v1733_v18, -inf  ;;  %v538_v30 = vmax.f32 %v520_v26, %v521_v27  ;;  %v391_v31 = vperm.slane %v377_v19, 0  ;;  %v392_v32 = vperm.slane %v377_v19, 1 }
  0x23   : > { %v393_v33 = vperm.slane %v377_v19, 2  ;;  %v394_v34 = vperm.slane %v377_v19, 3  ;;  %v356_v35 = vrot.slane %v355_v12, 1  ;;  %v395_v36 = vperm.slane %v1725_v9, 0 }
  0x24   : > { %vm592_vm10 = vcmp.gt.f32.partialorder %v1741_v13, 0.5  ;;  %vm593_vm11 = vcmp.gt.f32.partialorder %v1746_v20, 0.5  ;;  %v539_v37 = vmax.f32 %v538_v30, %v522_v28  ;;  %v433_v38 = vsel %vm344_vm0, %v391_v31, -inf }
  0x25   : > { %v434_v42 = vsel %vm344_vm0, %v392_v32, -inf  ;;  %v396_v43 = vperm.slane %v1725_v9, 1  ;;  %vm707_vm14 = vcmask 1042432   ;;  %695 = vmax.xlane.f32.xlu2 %v694_v21  ;;  %v436_v45 = vsel %vm344_vm0, %v393_v33, -inf }
  0x26   : > { %v435_v44 = vmax.f32 %v433_v38, %v434_v42  ;;  %v438_v46 = vsel %vm344_vm0, %v394_v34, -inf  ;;  %v1768_v47 = vperm.slane %v356_v35, 0  ;;  %v540_v49 = vmax.f32 %v539_v37, %v523_v29  ;;  %v1831_v37 = vld [vmem:[%s2817_s3 + $0x30] sm:$0xff] }
  0x27   : > { %v1770_v50 = vperm.slane %v356_v35, 1  ;;  %v1772_v51 = vperm.slane %v356_v35, 2  ;;  %v1774_v52 = vperm.slane %v356_v35, 3  ;;  %v376_v55 = vsel %vm338_vm7, %v356_v35, -inf  ;;  %v1821_v35 = vld [vmem:[%s2817_s3 + $0x20] sm:$0xff] }
  0x28   : > { %v437_v53 = vmax.f32 %v435_v44, %v436_v45  ;;  %v516_v54 = vsel %vm468_vm3, %v1768_v47, -inf  ;;  %v397_v56 = vperm.slane %v1725_v9, 2  ;;  %541 = vmax.xlane.f32.xlu0 %v540_v49  ;;  %v387_v0 = vperm.slane %v376_v55, 0  ;;  %v1844_v45 = vld [vmem:[%s2817_s3 + $0x38] sm:$0xff] }
  0x29   : > { %v517_v57 = vsel %vm469_vm4, %v1770_v50, -inf  ;;  %v518_v58 = vsel %vm2853_vm2, %v1772_v51, -inf  ;;  %v519_v59 = vsel %vm2854_vm9, %v1774_v52, -inf  ;;  %v388_v4 = vperm.slane %v376_v55, 1 }
  0x2a   : > { %v439_v60 = vmax.f32 %v437_v53, %v438_v46  ;;  %v533_v61 = vmax.f32 %v516_v54, %v517_v57  ;;  %v389_v62 = vperm.slane %v376_v55, 2  ;;  %v390_v1 = vperm.slane %v376_v55, 3  ;;  %v1850_v55 = vld [vmem:[%s2817_s3 + $0x40] sm:$0xff] }
  0x2b   : > { %v424_v8 = vsel %vm344_vm0, %v387_v0, -inf  ;;  %v398_v2 = vperm.slane %v1725_v9, 3  ;;  %v442_v11 = vsel %vm344_vm0, %v395_v36, -inf  ;;  %v425_v19 = vsel %vm344_vm0, %v388_v4, -inf  ;;  %v1826_v36 = vld [vmem:[%s2817_s3 + $0x28] sm:$0xff] }
  0x2c   : > { %440 = vmax.xlane.f32.xlu1 %v439_v60  ;;  %v534_v17 = vmax.f32 %v533_v61, %v518_v58  ;;  %v427_v12 = vsel %vm344_vm0, %v389_v62, -inf  ;;  %v443_v21 = vsel %vm344_vm0, %v396_v43, -inf  ;;  %v426_v26 = vmax.f32 %v424_v8, %v425_v19  ;;  %v1864_v58 = vld [vmem:[%s2817_s3 + $0x50] sm:$0xff] }
  0x2d   : > { %v429_v27 = vsel %vm344_vm0, %v390_v1, -inf  ;;  %v444_v28 = vmax.f32 %v442_v11, %v443_v21  ;;  %v445_v9 = vsel %vm344_vm0, %v397_v56, -inf  ;;  %v447_v30 = vsel %vm344_vm0, %v398_v2, -inf  ;;  %v1855_v56 = vld [vmem:[%s2817_s3 + $0x48] sm:$0xff] }
  0x2e   : > { %v535_v29 = vmax.f32 %v534_v17, %v519_v59  ;;  %vm594_vm3 = vcmp.gt.f32.partialorder %v1794_v63, 0.5  ;;  %vm2826_vm4 = vcmp.gt.f32.partialorder %v1802_v3, 0.5  ;;  %v428_v31 = vmax.f32 %v426_v26, %v427_v12  ;;  %v1869_v59 = vld [vmem:[%s2817_s3 + $0x58] sm:$0xff] }
  0x2f   : > { %v446_v32 = vmax.f32 %v444_v28, %v445_v9  ;;  %v640_v33 = vsel %vm592_vm10, %v1662_v22, -inf  ;;  %v641_v34 = vsel %vm593_vm11, %v1664_v23, -inf  ;;  %v642_v38 = vsel %vm594_vm3, %v1666_v24, -inf }
  0x30   : > { %536 = vmax.xlane.f32.xlu2 %v535_v29  ;;  %v643_v42 = vsel %vm2826_vm4, %v1668_v25, -inf  ;;  %v708_v43 = vsel %vm707_vm14, %v640_v33, -inf  ;;  %v709_v44 = vsel %vm707_vm14, %v641_v34, -inf  ;;  %v430_v46 = vmax.f32 %v428_v31, %v429_v27 }
  0x31   : > { %v448_v49 = vmax.f32 %v446_v32, %v447_v30  ;;  %v710_v53 = vmax.f32 %v708_v43, %v709_v44  ;;  %v711_v54 = vsel %vm707_vm14, %v642_v38, -inf  ;;  %v713_v57 = vsel %vm707_vm14, %v643_v42, -inf }
  0x32   : > { %vm584_vm0 = vcmp.gt.f32.partialorder %v1821_v35, 0.5  ;;  %vm585_vm7 = vcmp.gt.f32.partialorder %v1826_v36, 0.5  ;;  %vm2827_vm2 = vcmp.gt.f32.partialorder %v1831_v37, 0.5  ;;  %431 = vmax.xlane.f32.xlu0 %v430_v46  ;;  %vm587_vm9 = vcmp.gt.f32.partialorder %v1844_v45, 0.5  ;;  %v2122_v45 = vld [vmem:[%s2818_s4 + $0x30] sm:$0xff] }
  0x33   : > { %v712_v0 = vmax.f32 %v710_v53, %v711_v54  ;;  %v632_v60 = vsel %vm584_vm0, %v1662_v22, -inf  ;;  %v633_v61 = vsel %vm585_vm7, %v1664_v23, -inf  ;;  %v634_v4 = vsel %vm2827_vm2, %v1666_v24, -inf }
  0x34   : > { %449 = vmax.xlane.f32.xlu1 %v448_v49  ;;  %v635_v62 = vsel %vm587_vm9, %v1668_v25, -inf  ;;  %v697_v1 = vmax.f32 %v632_v60, %v633_v61  ;;  %vm588_vm8 = vcmp.gt.f32.partialorder %v1850_v55, 0.5  ;;  %vm589_vm1 = vcmp.gt.f32.partialorder %v1855_v56, 0.5  ;;  %v2066_v55 = vld [vmem:[%s2818_s4] sm:$0xff]  ;;  %v2071_v56 = vld [vmem:[%s2818_s4 + $0x8] sm:$0xff] }
  0x35   : > { %v714_v8 = vmax.f32 %v712_v0, %v713_v57  ;;  %vm590_vm15 = vcmp.gt.f32.partialorder %v1864_v58, 0.5  ;;  %vm591_vm4 = vcmp.gt.f32.partialorder %v1869_v59, 0.5  ;;  %v636_v11 = vsel %vm588_vm8, %v1662_v22, -inf  ;;  %v2099_v58 = vld [vmem:[%s2818_s4 + $0x20] sm:$0xff] }
  0x36   : > { %v698_v2 = vmax.f32 %v697_v1, %v634_v4  ;;  %v637_v17 = vsel %vm589_vm1, %v1664_v23, -inf  ;;  %v638_v19 = vsel %vm590_vm15, %v1666_v24, -inf  ;;  %v639_v12 = vsel %vm591_vm4, %v1668_v25, -inf }
  0x37   : > { %v702_v21 = vmax.f32 %v636_v11, %v637_v17  ;;  %v652_v26 = vsel %vm588_vm8, %v1768_v47, -inf  ;;  %v653_v27 = vsel %vm589_vm1, %v1770_v50, -inf  ;;  %v654_v9 = vsel %vm590_vm15, %v1772_v51, -inf }
  0x38   : > { %715 = vmax.xlane.f32.xlu2 %v714_v8  ;;  %v699_v28 = vmax.f32 %v698_v2, %v635_v62  ;;  %v655_v29 = vsel %vm591_vm4, %v1774_v52, -inf  ;;  %v727_v30 = vmax.f32 %v652_v26, %v653_v27  ;;  %v644_v32 = vsel %vm580_vm12, %v1768_v47, -inf }
  0x39   : > { %v703_v31 = vmax.f32 %v702_v21, %v638_v19  ;;  %v645_v33 = vsel %vm581_vm13, %v1770_v50, -inf  ;;  %v646_v34 = vsel %vm582_vm6, %v1772_v51, -inf  ;;  %v648_v43 = vsel %vm584_vm0, %v1768_v47, -inf }
  0x3a   : > { %v728_v38 = vmax.f32 %v727_v30, %v654_v9  ;;  %v717_v42 = vmax.f32 %v644_v32, %v645_v33  ;;  %700 = vmax.xlane.f32.xlu0 %v699_v28  ;;  %v647_v46 = vsel %vm583_vm5, %v1774_v52, -inf  ;;  %v649_v49 = vsel %vm585_vm7, %v1770_v50, -inf }
  0x3b   : > { %v704_v44 = vmax.f32 %v703_v31, %v639_v12  ;;  %v650_v53 = vsel %vm2827_vm2, %v1772_v51, -inf  ;;  %v722_v0 = vmax.f32 %v648_v43, %v649_v49  ;;  %v664_v60 = vsel %vm584_vm0, %v1727_v14, -inf }
  0x3c   : > { %v729_v54 = vmax.f32 %v728_v38, %v655_v29  ;;  %v718_v57 = vmax.f32 %v717_v42, %v646_v34  ;;  %v665_v61 = vsel %vm585_vm7, %v1729_v15, -inf  ;;  %v666_v4 = vsel %vm2827_vm2, %v1731_v16, -inf }
  0x3d   : > { %705 = vmax.xlane.f32.xlu1 %v704_v44  ;;  %v656_v62 = vsel %vm592_vm10, %v1768_v47, -inf  ;;  %v651_v1 = vsel %vm587_vm9, %v1774_v52, -inf  ;;  %v723_v8 = vmax.f32 %v722_v0, %v650_v53  ;;  %v746_v2 = vmax.f32 %v664_v60, %v665_v61 }
  0x3e   : > { %v657_v11 = vsel %vm593_vm11, %v1770_v50, -inf  ;;  %v719_v17 = vmax.f32 %v718_v57, %v647_v46  ;;  %v658_v19 = vsel %vm594_vm3, %v1772_v51, -inf  ;;  %v732_v12 = vsel %vm707_vm14, %v656_v62, -inf }
  0x3f   : > { %v733_v21 = vsel %vm707_vm14, %v657_v11, -inf  ;;  %v747_v26 = vmax.f32 %v746_v2, %v666_v4  ;;  %vm2855_vm2 = vcmp.gt.f32.partialorder %v1802_v3, 0.5  ;;  %v735_v9 = vsel %vm707_vm14, %v658_v19, -inf }
  0x40   : > { %730 = vmax.xlane.f32.xlu2 %v729_v54  ;;  %v659_v27 = vsel %vm2855_vm2, %v1774_v52, -inf  ;;  %v734_v28 = vmax.f32 %v732_v12, %v733_v21  ;;  %v724_v29 = vmax.f32 %v723_v8, %v651_v1  ;;  %v667_v30 = vsel %vm587_vm9, %v1733_v18, -inf }
  0x41   : > { %v660_v31 = vsel %vm580_vm12, %v1727_v14, -inf  ;;  %v661_v32 = vsel %vm581_vm13, %v1729_v15, -inf  ;;  %v662_v34 = vsel %vm582_vm6, %v1731_v16, -inf  ;;  %v737_v42 = vsel %vm707_vm14, %v659_v27, -inf }
  0x42   : > { %v736_v33 = vmax.f32 %v734_v28, %v735_v9  ;;  %v741_v38 = vmax.f32 %v660_v31, %v661_v32  ;;  %720 = vmax.xlane.f32.xlu0 %v719_v17  ;;  %v676_v43 = vsel %vm580_vm12, %v1686_v39, -inf  ;;  %v677_v44 = vsel %vm581_vm13, %v1688_v40, -inf }
  0x43   : > { %v748_v46 = vmax.f32 %v747_v26, %v667_v30  ;;  %v765_v49 = vmax.f32 %v676_v43, %v677_v44  ;;  %v668_v53 = vsel %vm588_vm8, %v1727_v14, -inf  ;;  %v678_v57 = vsel %vm582_vm6, %v1690_v41, -inf  ;;  %vm2857_vm6 = vmmov %vm2855_vm2 }
  0x44   : > { %v742_v54 = vmax.f32 %v741_v38, %v662_v34  ;;  %v669_v5 = vsel %vm589_vm1, %v1729_v15, -inf  ;;  %v672_v6 = vsel %vm592_vm10, %v1727_v14, -inf  ;;  %v738_v0 = vmax.f32 %v736_v33, %v737_v42  ;;  %v2035_v33 = vld [vmem:[%s2818_s4 + $0x40] sm:$0xff]  ;;  %v2040_v34 = vld [vmem:[%s2818_s4 + $0x48] sm:$0xff] }
  0x45   : > { %725 = vmax.xlane.f32.xlu1 %v724_v29  ;;  %v663_v60 = vsel %vm583_vm5, %v1733_v18, -inf  ;;  %v673_v61 = vsel %vm593_vm11, %v1729_v15, -inf  ;;  %v751_v4 = vmax.f32 %v668_v53, %v669_v5  ;;  %v674_v7 = vsel %vm594_vm3, %v1731_v16, -inf }
  0x46   : > { %v756_v62 = vsel %vm707_vm14, %v672_v6, -inf  ;;  %v757_v1 = vsel %vm707_vm14, %v673_v61, -inf  ;;  %v679_v8 = vsel %vm583_vm5, %v1696_v48, -inf  ;;  %v766_v2 = vmax.f32 %v765_v49, %v678_v57  ;;  %vm2856_vm5 = vmmov %vm2855_vm2 }
  0x47   : > { %v670_v11 = vsel %vm590_vm15, %v1731_v16, -inf  ;;  %v758_v17 = vmax.f32 %v756_v62, %v757_v1  ;;  %v743_v19 = vmax.f32 %v742_v54, %v663_v60  ;;  %v759_v12 = vsel %vm707_vm14, %v674_v7, -inf  ;;  %v2087_v60 = vld [vmem:[%s2818_s4 + $0x10] sm:$0xff]  ;;  %v2104_v7 = vld [vmem:[%s2818_s4 + $0x28] sm:$0xff] }
  0x48   : > { %749 = vmax.xlane.f32.xlu2 %v748_v46  ;;  %v688_v21 = vsel %vm592_vm10, %v1686_v39, -inf  ;;  %v689_v26 = vsel %vm593_vm11, %v1688_v40, -inf  ;;  %v671_v10 = vsel %vm591_vm4, %v1733_v18, -inf  ;;  %v690_v27 = vsel %vm594_vm3, %v1690_v41, -inf  ;;  %v2056_v46 = vld [vmem:[%s2818_s4 + $0x50] sm:$0xff] }
  0x49   : > { %v780_v28 = vsel %vm707_vm14, %v688_v21, -inf  ;;  %v752_v9 = vmax.f32 %v751_v4, %v670_v11  ;;  %v675_v13 = vsel %vm2856_vm5, %v1733_v18, -inf  ;;  %v781_v29 = vsel %vm707_vm14, %v689_v26, -inf  ;;  %v2092_v4 = vld [vmem:[%s2818_s4 + $0x58] sm:$0xff] }
  0x4a   : > { %739 = vmax.xlane.f32.xlu0 %v738_v0  ;;  %v680_v20 = vsel %vm584_vm0, %v1686_v39, -inf  ;;  %v767_v30 = vmax.f32 %v766_v2, %v679_v8  ;;  %v760_v31 = vmax.f32 %v758_v17, %v759_v12  ;;  %v782_v32 = vmax.f32 %v780_v28, %v781_v29  ;;  %v2127_v12 = vld [vmem:[%s2818_s4 + $0xa0] sm:$0xff]  ;;  %v2136_v26 = vld [vmem:[%s2818_s4 + $0x18] sm:$0xff] }
  0x4b   : > { %v681_v63 = vsel %vm585_vm7, %v1688_v40, -inf  ;;  %v691_v35 = vsel %vm2857_vm6, %v1696_v48, -inf  ;;  %v783_v38 = vsel %vm707_vm14, %v690_v27, -inf  ;;  %v684_v36 = vsel %vm588_vm8, %v1686_v39, -inf }
  0x4c   : > { %v685_v42 = vsel %vm589_vm1, %v1688_v40, -inf  ;;  %v761_v43 = vsel %vm707_vm14, %v675_v13, -inf  ;;  %v770_v44 = vmax.f32 %v680_v20, %v681_v63  ;;  %v753_v3 = vmax.f32 %v752_v9, %v671_v10  ;;  %v2143_v10 = vld [vmem:[%s2818_s4 + $0xa8] sm:$0xff]  ;;  %v2154_v13 = vld [vmem:[%s2818_s4 + $0xb0] sm:$0xff] }
  0x4d   : > { %744 = vmax.xlane.f32.xlu1 %v743_v19  ;;  %vm2858_vm12 = vcmp.gt.f32.partialorder %v1831_v37, 0.5  ;;  %vm885_vm13 = vcmp.gt.f32.partialorder %v2035_v33, 0.5  ;;  %vm2834_vm8 = vcmp.gt.f32.partialorder %v2040_v34, 0.5  ;;  %v784_v53 = vmax.f32 %v782_v32, %v783_v38 }
  0x4e   : > { %v682_v49 = vsel %vm2858_vm12, %v1690_v41, -inf  ;;  %v785_v54 = vsel %vm707_vm14, %v691_v35, -inf  ;;  %v775_v37 = vmax.f32 %v684_v36, %v685_v42  ;;  %v981_v57 = vsel %vm885_vm13, %v1662_v22, -inf  ;;  %v2178_v35 = vld [vmem:[%s2818_s4 + $0x38] sm:$0xff] }
  0x4f   : > { %v762_v5 = vmax.f32 %v760_v31, %v761_v43  ;;  %v686_v6 = vsel %vm590_vm15, %v1690_v41, -inf  ;;  %vm2832_vm1 = vcmp.gt.f32.partialorder %v2056_v46, 0.5  ;;  %v982_v0 = vsel %vm2834_vm8, %v1664_v23, -inf  ;;  %v2169_v31 = vld [vmem:[%s2818_s4 + $0x68] sm:$0xff]  ;;  %v2184_v36 = vld [vmem:[%s2818_s4 + $0xb8] sm:$0xff] }
  0x50   : > { %768 = vmax.xlane.f32.xlu2 %v767_v30  ;;  %v771_v61 = vmax.f32 %v770_v44, %v682_v49  ;;  %vm2837_vm10 = vcmp.gt.f32.partialorder %v2066_v55, 0.5  ;;  %vm2836_vm15 = vcmp.gt.f32.partialorder %v2071_v56, 0.5  ;;  %v683_v62 = vsel %vm587_vm9, %v1696_v48, -inf  ;;  %v2164_v30 = vld [vmem:[%s2818_s4 + $0x60] sm:$0xff]  ;;  %v2199_v49 = vld [vmem:[%s2818_s4 + $0x70] sm:$0xff] }
  0x51   : > { %v1111_v1 = vmax.f32 %v981_v57, %v982_v0  ;;  %v973_v8 = vsel %vm2837_vm10, %v1662_v22, -inf  ;;  %v974_v2 = vsel %vm2836_vm15, %v1664_v23, -inf  ;;  %v786_v11 = vmax.f32 %v784_v53, %v785_v54  ;;  %v2206_v53 = vld [vmem:[%s2818_s4 + $0x80] sm:$0xff]  ;;  %v2211_v54 = vld [vmem:[%s2818_s4 + $0x88] sm:$0xff]  ;;  %v2224_v0 = vld [vmem:[%s2818_s4 + $0x78] sm:$0xff] }
  0x52   : > { %754 = vmax.xlane.f32.xlu0 %v753_v3  ;;  %v776_v17 = vmax.f32 %v775_v37, %v686_v6  ;;  %v983_v19 = vsel %vm2832_vm1, %v1666_v24, -inf  ;;  %vm2841_vm11 = vcmp.gt.f32.partialorder %v2087_v60, 0.5  ;;  %v687_v21 = vsel %vm591_vm4, %v1696_v48, -inf }
  0x53   : > { %vm2828_vm14 = vcmp.gt.f32.partialorder %v2092_v4, 0.5  ;;  %vm881_vm3 = vcmp.gt.f32.partialorder %v2099_v58, 0.5  ;;  %vm882_vm0 = vcmp.gt.f32.partialorder %v2104_v7, 0.5  ;;  %v772_v27 = vmax.f32 %v771_v61, %v683_v62 }
  0x54   : > { %v1101_v28 = vmax.f32 %v973_v8, %v974_v2  ;;  %v977_v59 = vsel %vm881_vm3, %v1662_v22, -inf  ;;  %v978_v9 = vsel %vm882_vm0, %v1664_v23, -inf  ;;  %v1112_v29 = vmax.f32 %v1111_v1, %v983_v19  ;;  %v2235_v1 = vld [vmem:[%s2818_s4 + $0x90] sm:$0xff] }
  0x55   : > { %763 = vmax.xlane.f32.xlu1 %v762_v5  ;;  %v975_v20 = vsel %vm2841_vm11, %v1666_v24, -inf  ;;  %vm2833_vm4 = vcmp.gt.f32.partialorder %v2122_v45, 0.5  ;;  %vm2831_vm7 = vcmp.gt.f32.partialorder %v2127_v12, 0.5  ;;  %v777_v32 = vmax.f32 %v776_v17, %v687_v21  ;;  %v2252_v21 = vld [vmem:[%s2818_s4 + $0xc0] sm:$0xff] }
  0x56   : > { %v984_v63 = vsel %vm2828_vm14, %v1668_v25, -inf  ;;  %vm880_vm2 = vcmp.gt.f32.partialorder %v2136_v26, 0.5  ;;  %vm2829_vm9 = vcmp.gt.f32.partialorder %v2143_v10, 0.5  ;;  %v1106_v38 = vmax.f32 %v977_v59, %v978_v9  ;;  %v2259_v59 = vld [vmem:[%s2818_s4 + $0xc8] sm:$0xff] }
  0x57   : > { %vm2830_vm5 = vcmp.gt.f32.partialorder %v2154_v13, 0.5  ;;  %v993_v42 = vsel %vm2831_vm7, %v1662_v22, -inf  ;;  %v994_v43 = vsel %vm2829_vm9, %v1664_v23, -inf  ;;  %v1102_v44 = vmax.f32 %v1101_v28, %v975_v20  ;;  %v2270_v20 = vld [vmem:[%s2818_s4 + $0x98] sm:$0xff] }
  0x58   : > { %787 = vmax.xlane.f32.xlu2 %v786_v11  ;;  %v979_v3 = vsel %vm2833_vm4, %v1666_v24, -inf  ;;  %vm889_vm6 = vcmp.gt.f32.partialorder %v2164_v30, 0.5  ;;  %vm890_vm12 = vcmp.gt.f32.partialorder %v2169_v31, 0.5  ;;  %v1113_v37 = vmax.f32 %v1112_v29, %v984_v63 }
  0x59   : > { %v976_v57 = vsel %vm880_vm2, %v1668_v25, -inf  ;;  %vm884_vm14 = vcmp.gt.f32.partialorder %v2178_v35, 0.5  ;;  %v1126_v5 = vmax.f32 %v993_v42, %v994_v43  ;;  %vm2835_vm9 = vcmp.gt.f32.partialorder %v2184_v36, 0.5  ;;  %v2282_v43 = vld [vmem:[%s2818_s4 + $0xe0] sm:$0xff] }
  0x5a   : > { %773 = vmax.xlane.f32.xlu0 %v772_v27  ;;  %v995_v6 = vsel %vm2830_vm5, %v1666_v24, -inf  ;;  %v985_v61 = vsel %vm889_vm6, %v1662_v22, -inf  ;;  %v986_v62 = vsel %vm890_vm12, %v1664_v23, -inf  ;;  %v1107_v8 = vmax.f32 %v1106_v38, %v979_v3 }
  0x5b   : > { %vm891_vm5 = vcmp.gt.f32.partialorder %v2199_v49, 0.5  ;;  %vm2840_vm7 = vcmp.gt.f32.partialorder %v2206_v53, 0.5  ;;  %vm2839_vm1 = vcmp.gt.f32.partialorder %v2211_v54, 0.5  ;;  %v1103_v2 = vmax.f32 %v1102_v44, %v976_v57  ;;  %v2287_v44 = vld [vmem:[%s2818_s4 + $0xe8] sm:$0xff]  ;;  %v2298_v57 = vld [vmem:[%s2818_s4 + $0xd0] sm:$0xff] }
  0x5c   : > { %v980_v11 = vsel %vm884_vm14, %v1668_v25, -inf  ;;  %v989_v17 = vsel %vm2840_vm7, %v1662_v22, -inf  ;;  %v990_v19 = vsel %vm2839_vm1, %v1664_v23, -inf  ;;  %v1127_v27 = vmax.f32 %v1126_v5, %v995_v6 }
  0x5d   : > { %778 = vmax.xlane.f32.xlu1 %v777_v32  ;;  %vm892_vm4 = vcmp.gt.f32.partialorder %v2224_v0, 0.5  ;;  %v1116_v28 = vmax.f32 %v985_v61, %v986_v62  ;;  %vm2838_vm8 = vcmp.gt.f32.partialorder %v2235_v1, 0.5  ;;  %v996_v9 = vsel %vm2835_vm9, %v1668_v25, -inf }
  0x5e   : > { %v987_v29 = vsel %vm891_vm5, %v1666_v24, -inf  ;;  %v1005_v32 = vsel %vm2837_vm10, %v1768_v47, -inf  ;;  %v1006_v63 = vsel %vm2836_vm15, %v1770_v50, -inf  ;;  %v1108_v38 = vmax.f32 %v1107_v8, %v980_v11  ;;  %v2311_v11 = vld [vmem:[%s2818_s4 + $0xf0] sm:$0xff] }
  0x5f   : > { %v1121_v42 = vmax.f32 %v989_v17, %v990_v19  ;;  %vm901_vm9 = vcmp.gt.f32.partialorder %v2252_v21, 0.5  ;;  %v988_v3 = vsel %vm892_vm4, %v1668_v25, -inf  ;;  %vm2847_vm15 = vcmp.gt.f32.partialorder %v2259_v59, 0.5  ;;  %v2321_v19 = vld [vmem:[%s2818_s4 + $0xd8] sm:$0xff] }
  0x60   : > { %1114 = vmax.xlane.f32.xlu2 %v1113_v37  ;;  %v991_v37 = vsel %vm2838_vm8, %v1666_v24, -inf  ;;  %v1128_v5 = vmax.f32 %v1127_v27, %v996_v9  ;;  %v1117_v6 = vmax.f32 %v1116_v28, %v987_v29  ;;  %vm2842_vm10 = vcmp.gt.f32.partialorder %v2270_v20, 0.5 }
  0x61   : > { %v1141_v61 = vmax.f32 %v1005_v32, %v1006_v63  ;;  %v997_v62 = vsel %vm901_vm9, %v1662_v22, -inf  ;;  %v998_v8 = vsel %vm2847_vm15, %v1664_v23, -inf  ;;  %vm2845_vm8 = vcmp.gt.f32.partialorder %v2282_v43, 0.5 }
  0x62   : > { %1104 = vmax.xlane.f32.xlu0 %v1103_v2  ;;  %vm2843_vm1 = vcmp.gt.f32.partialorder %v2287_v44, 0.5  ;;  %v1122_v2 = vmax.f32 %v1121_v42, %v991_v37  ;;  %v1007_v17 = vsel %vm2841_vm11, %v1772_v51, -inf  ;;  %vm2848_vm7 = vcmp.gt.f32.partialorder %v2298_v57, 0.5 }
  0x63   : > { %v992_v27 = vsel %vm2842_vm10, %v1668_v25, -inf  ;;  %v1001_v28 = vsel %vm2845_vm8, %v1662_v22, -inf  ;;  %v1002_v9 = vsel %vm2843_vm1, %v1664_v23, -inf  ;;  %v1118_v29 = vmax.f32 %v1117_v6, %v988_v3  ;;  %v2344_v23 = vld [vmem:[%s2818_s4 + $0xf8] sm:$0xff] }
  0x64   : > { %v1131_v32 = vmax.f32 %v997_v62, %v998_v8  ;;  %vm2844_vm11 = vcmp.gt.f32.partialorder %v2311_v11, 0.5  ;;  %v1008_v63 = vsel %vm880_vm2, %v1774_v52, -inf  ;;  %vm904_vm10 = vcmp.gt.f32.partialorder %v2321_v19, 0.5 }
  0x65   : > { %1109 = vmax.xlane.f32.xlu1 %v1108_v38  ;;  %v1142_v38 = vmax.f32 %v1141_v61, %v1007_v17  ;;  %v999_v22 = vsel %vm2848_vm7, %v1666_v24, -inf  ;;  %v1123_v42 = vmax.f32 %v1122_v2, %v992_v27  ;;  %v1136_v3 = vmax.f32 %v1001_v28, %v1002_v9 }
  0x66   : > { %v1017_v37 = vsel %vm889_vm6, %v1768_v47, -inf  ;;  %v1003_v6 = vsel %vm2844_vm11, %v1666_v24, -inf  ;;  %v1000_v61 = vsel %vm904_vm10, %v1668_v25, -inf  ;;  %v1132_v62 = vmax.f32 %v1131_v32, %v999_v22 }
  0x67   : > { %vm2846_vm1 = vcmp.gt.f32.partialorder %v2344_v23, 0.5  ;;  %v1143_v8 = vmax.f32 %v1142_v38, %v1008_v63  ;;  %v1009_v17 = vsel %vm881_vm3, %v1768_v47, -inf  ;;  %v1010_v27 = vsel %vm882_vm0, %v1770_v50, -inf }
  0x68   : > { %1129 = vmax.xlane.f32.xlu2 %v1128_v5  ;;  %v1018_v5 = vsel %vm890_vm12, %v1770_v50, -inf  ;;  %v1137_v24 = vmax.f32 %v1136_v3, %v1003_v6  ;;  %v1019_v28 = vsel %vm891_vm5, %v1772_v51, -inf  ;;  %v1004_v9 = vsel %vm2846_vm1, %v1668_v25, -inf }
  0x69   : > { %v1156_v2 = vmax.f32 %v1017_v37, %v1018_v5  ;;  %vm2859_vm11 = vcmp.gt.f32.partialorder %v2040_v34, 0.5  ;;  %v1133_v63 = vmax.f32 %v1132_v62, %v1000_v61  ;;  %v1146_v38 = vmax.f32 %v1009_v17, %v1010_v27 }
  0x6a   : > { %1119 = vmax.xlane.f32.xlu0 %v1118_v29  ;;  %v1013_v29 = vsel %vm885_vm13, %v1768_v47, -inf  ;;  %v1014_v32 = vsel %vm2859_vm11, %v1770_v50, -inf  ;;  %vm2860_vm8 = vcmp.gt.f32.partialorder %v2122_v45, 0.5  ;;  %v1029_v25 = vsel %vm901_vm9, %v1768_v47, -inf }
  0x6b   : > { %v1157_v22 = vmax.f32 %v1156_v2, %v1019_v28  ;;  %v1030_v3 = vsel %vm2847_vm15, %v1770_v50, -inf  ;;  %v1138_v37 = vmax.f32 %v1137_v24, %v1004_v9  ;;  %v1020_v5 = vsel %vm892_vm4, %v1774_v52, -inf }
  0x6c   : > { %v1151_v6 = vmax.f32 %v1013_v29, %v1014_v32  ;;  %vm2861_vm11 = vcmp.gt.f32.partialorder %v2056_v46, 0.5  ;;  %v1012_v62 = vsel %vm884_vm14, %v1774_v52, -inf  ;;  %v1171_v2 = vmax.f32 %v1029_v25, %v1030_v3 }
  0x6d   : > { %1124 = vmax.xlane.f32.xlu1 %v1123_v42  ;;  %v1011_v42 = vsel %vm2860_vm8, %v1772_v51, -inf  ;;  %v1015_v61 = vsel %vm2861_vm11, %v1772_v51, -inf  ;;  %v1158_v17 = vmax.f32 %v1157_v22, %v1020_v5  ;;  %v1031_v27 = vsel %vm2848_vm7, %v1772_v51, -inf }
  0x6e   : > { %vm2862_vm8 = vcmp.gt.f32.partialorder %v2206_v53, 0.5  ;;  %vm2863_vm1 = vcmp.gt.f32.partialorder %v2211_v54, 0.5  ;;  %v1152_v9 = vmax.f32 %v1151_v6, %v1015_v61  ;;  %vm2864_vm11 = vcmp.gt.f32.partialorder %v2127_v12, 0.5 }
  0x6f   : > { %v1021_v24 = vsel %vm2862_vm8, %v1768_v47, -inf  ;;  %v1022_v28 = vsel %vm2863_vm1, %v1770_v50, -inf  ;;  %v1025_v29 = vsel %vm2864_vm11, %v1768_v47, -inf  ;;  %vm2865_vm15 = vcmp.gt.f32.partialorder %v2143_v10, 0.5 }
  0x70   : > { %1144 = vmax.xlane.f32.xlu2 %v1143_v8  ;;  %v1147_v8 = vmax.f32 %v1146_v38, %v1011_v42  ;;  %v1026_v32 = vsel %vm2865_vm15, %v1770_v50, -inf  ;;  %vm2866_vm7 = vcmp.gt.f32.partialorder %v2092_v4, 0.5  ;;  %v1172_v22 = vmax.f32 %v1171_v2, %v1031_v27 }
  0x71   : > { %v1161_v42 = vmax.f32 %v1021_v24, %v1022_v28  ;;  %v1032_v25 = vsel %vm904_vm10, %v1774_v52, -inf  ;;  %vm2867_vm1 = vcmp.gt.f32.partialorder %v2235_v1, 0.5  ;;  %vm2868_vm15 = vcmp.gt.f32.partialorder %v2154_v13, 0.5 }
  0x72   : > { %1134 = vmax.xlane.f32.xlu0 %v1133_v63  ;;  %v1016_v63 = vsel %vm2866_vm7, %v1774_v52, -inf  ;;  %v1148_v38 = vmax.f32 %v1147_v8, %v1012_v62  ;;  %v1023_v3 = vsel %vm2867_vm1, %v1772_v51, -inf  ;;  %v1027_v6 = vsel %vm2868_vm15, %v1772_v51, -inf }
  0x73   : > { %v1153_v5 = vmax.f32 %v1152_v9, %v1016_v63  ;;  %v1045_v61 = vsel %vm885_vm13, %v1727_v14, -inf  ;;  %vm2869_vm7 = vcmp.gt.f32.partialorder %v2040_v34, 0.5  ;;  %v1173_v8 = vmax.f32 %v1172_v22, %v1032_v25 }
  0x74   : > { %v1046_v62 = vsel %vm2869_vm7, %v1729_v15, -inf  ;;  %vm2870_vm8 = vcmp.gt.f32.partialorder %v2270_v20, 0.5  ;;  %vm2871_vm11 = vcmp.gt.f32.partialorder %v2066_v55, 0.5  ;;  %vm2872_vm1 = vcmp.gt.f32.partialorder %v2071_v56, 0.5 }
  0x75   : > { %1139 = vmax.xlane.f32.xlu1 %v1138_v37  ;;  %v1166_v37 = vmax.f32 %v1025_v29, %v1026_v32  ;;  %v1024_v2 = vsel %vm2870_vm8, %v1774_v52, -inf  ;;  %v1191_v24 = vmax.f32 %v1045_v61, %v1046_v62  ;;  %v1037_v28 = vsel %vm2871_vm11, %v1727_v14, -inf }
  0x76   : > { %v1038_v9 = vsel %vm2872_vm1, %v1729_v15, -inf  ;;  %vm2873_vm15 = vcmp.gt.f32.partialorder %v2184_v36, 0.5  ;;  %vm2874_vm7 = vcmp.gt.f32.partialorder %v2056_v46, 0.5  ;;  %v1041_v63 = vsel %vm881_vm3, %v1727_v14, -inf }
  0x77   : > { %v1167_v27 = vmax.f32 %v1166_v37, %v1027_v6  ;;  %v1028_v29 = vsel %vm2873_vm15, %v1774_v52, -inf  ;;  %v1047_v32 = vsel %vm2874_vm7, %v1731_v16, -inf  ;;  %vm2875_vm8 = vcmp.gt.f32.partialorder %v2092_v4, 0.5 }
  0x78   : > { %1159 = vmax.xlane.f32.xlu2 %v1158_v17  ;;  %v1162_v17 = vmax.f32 %v1161_v42, %v1023_v3  ;;  %v1048_v42 = vsel %vm2875_vm8, %v1733_v18, -inf  ;;  %v1181_v25 = vmax.f32 %v1037_v28, %v1038_v9  ;;  %v1192_v37 = vmax.f32 %v1191_v24, %v1047_v32 }
  0x79   : > { %v1168_v3 = vmax.f32 %v1167_v27, %v1028_v29  ;;  %vm2876_vm11 = vcmp.gt.f32.partialorder %v2087_v60, 0.5  ;;  %v1049_v61 = vsel %vm889_vm6, %v1727_v14, -inf  ;;  %v1050_v62 = vsel %vm890_vm12, %v1729_v15, -inf }
  0x7a   : > { %1149 = vmax.xlane.f32.xlu0 %v1148_v38  ;;  %v1042_v38 = vsel %vm882_vm0, %v1729_v15, -inf  ;;  %v1163_v22 = vmax.f32 %v1162_v17, %v1024_v2  ;;  %vm2877_vm1 = vcmp.gt.f32.partialorder %v2066_v55, 0.5  ;;  %vm2878_vm15 = vcmp.gt.f32.partialorder %v2071_v56, 0.5 }
  0x7b   : > { %v1186_v6 = vmax.f32 %v1041_v63, %v1042_v38  ;;  %v1069_v2 = vsel %vm2877_vm1, %v1686_v39, -inf  ;;  %vm2879_vm7 = vcmp.gt.f32.partialorder %v2122_v45, 0.5  ;;  %v1073_v27 = vsel %vm881_vm3, %v1686_v39, -inf  ;;  %vm2880_vm3 = vmmov %vm2876_vm11 }
  0x7c   : > { %v1043_v17 = vsel %vm2879_vm7, %v1731_v16, -inf  ;;  %v1074_v24 = vsel %vm882_vm0, %v1688_v40, -inf  ;;  %v1193_v55 = vmax.f32 %v1192_v37, %v1048_v42  ;;  %v1040_v56 = vsel %vm880_vm2, %v1733_v18, -inf  ;;  %vm2881_vm0 = vmmov %vm2879_vm7 }
  0x7d   : > { %1154 = vmax.xlane.f32.xlu1 %v1153_v5  ;;  %v1039_v5 = vsel %vm2876_vm11, %v1731_v16, -inf  ;;  %v1196_v9 = vmax.f32 %v1049_v61, %v1050_v62  ;;  %v1187_v32 = vmax.f32 %v1186_v6, %v1043_v17  ;;  %v1051_v58 = vsel %vm891_vm5, %v1731_v16, -inf }
  0x7e   : > { %v1182_v28 = vmax.f32 %v1181_v25, %v1039_v5  ;;  %v1071_v7 = vsel %vm2880_vm3, %v1690_v41, -inf  ;;  %v1226_v63 = vmax.f32 %v1073_v27, %v1074_v24  ;;  %v1044_v38 = vsel %vm884_vm14, %v1733_v18, -inf }
  0x7f   : > { %v1081_v25 = vsel %vm889_vm6, %v1686_v39, -inf  ;;  %v1052_v60 = vsel %vm892_vm4, %v1733_v18, -inf  ;;  %v1197_v37 = vmax.f32 %v1196_v9, %v1051_v58  ;;  %vm2882_vm8 = vcmp.gt.f32.partialorder %v2127_v12, 0.5 }
  0x80   : > { %1174 = vmax.xlane.f32.xlu2 %v1173_v8  ;;  %v1070_v8 = vsel %vm2878_vm15, %v1688_v40, -inf  ;;  %v1183_v42 = vmax.f32 %v1182_v28, %v1040_v56  ;;  %v1089_v45 = vsel %vm2882_vm8, %v1686_v39, -inf  ;;  %v1188_v6 = vmax.f32 %v1187_v32, %v1044_v38 }
  0x81   : > { %v1221_v29 = vmax.f32 %v1069_v2, %v1070_v8  ;;  %v1072_v30 = vsel %vm880_vm2, %v1696_v48, -inf  ;;  %vm2883_vm6 = vcmp.gt.f32.partialorder %v2143_v10, 0.5  ;;  %v1076_v62 = vsel %vm884_vm14, %v1696_v48, -inf }
  0x82   : > { %1164 = vmax.xlane.f32.xlu0 %v1163_v22  ;;  %v1075_v22 = vsel %vm2881_vm0, %v1690_v41, -inf  ;;  %v1090_v31 = vsel %vm2883_vm6, %v1688_v40, -inf  ;;  %v1083_v26 = vsel %vm891_vm5, %v1690_v41, -inf  ;;  %v1077_v17 = vsel %vm885_vm13, %v1686_v39, -inf }
  0x83   : > { %v1222_v5 = vmax.f32 %v1221_v29, %v1071_v7  ;;  %v1227_v61 = vmax.f32 %v1226_v63, %v1075_v22  ;;  %vm2885_vm2 = vcmp.gt.f32.partialorder %v2040_v34, 0.5  ;;  %v1246_v35 = vmax.f32 %v1089_v45, %v1090_v31 }
  0x84   : > { %v1078_v27 = vsel %vm2885_vm2, %v1688_v40, -inf  ;;  %v1198_v24 = vmax.f32 %v1197_v37, %v1052_v60  ;;  %vm2886_vm14 = vcmp.gt.f32.partialorder %v2184_v36, 0.5  ;;  %vm2887_vm13 = vcmp.gt.f32.partialorder %v2206_v53, 0.5 }
  0x85   : > { %1169 = vmax.xlane.f32.xlu1 %v1168_v3  ;;  %v1082_v3 = vsel %vm890_vm12, %v1688_v40, -inf  ;;  %vm2884_vm12 = vcmp.gt.f32.partialorder %v2154_v13, 0.5  ;;  %v1223_v28 = vmax.f32 %v1222_v5, %v1072_v30  ;;  %v2530_v49 = vsel %vm2886_vm14, %v1696_v48, -inf }
  0x86   : > { %v1236_v2 = vmax.f32 %v1081_v25, %v1082_v3  ;;  %v1091_v8 = vsel %vm2884_vm12, %v1690_v41, -inf  ;;  %v1228_v56 = vmax.f32 %v1227_v61, %v1076_v62  ;;  %v1053_v33 = vsel %vm2887_vm13, %v1727_v14, -inf }
  0x87   : > { %vm2888_vm5 = vcmp.gt.f32.partialorder %v2211_v54, 0.5  ;;  %v2538_v9 = vmax.f32 %v1246_v35, %v1091_v8  ;;  %v1231_v0 = vmax.f32 %v1077_v17, %v1078_v27  ;;  %v1093_v32 = vsel %vm901_vm9, %v1686_v39, -inf }
  0x88   : > { %1194 = vmax.xlane.f32.xlu2 %v1193_v55  ;;  %v1084_v55 = vsel %vm892_vm4, %v1696_v48, -inf  ;;  %v1054_v34 = vsel %vm2888_vm5, %v1729_v15, -inf  ;;  %v1237_v29 = vmax.f32 %v1236_v2, %v1083_v26  ;;  %vm2889_vm4 = vcmp.gt.f32.partialorder %v2259_v59, 0.5 }
  0x89   : > { %v1094_v58 = vsel %vm2889_vm4, %v1688_v40, -inf  ;;  %v1248_v7 = vmax.f32 %v2538_v9, %v2530_v49  ;;  %vm2890_vm11 = vcmp.gt.f32.partialorder %v2298_v57, 0.5  ;;  %vm2891_vm1 = vcmp.gt.f32.partialorder %v2282_v43, 0.5 }
  0x8a   : > { %1184 = vmax.xlane.f32.xlu0 %v1183_v42  ;;  %v1095_v63 = vsel %vm2890_vm11, %v1690_v41, -inf  ;;  %v1251_v38 = vmax.f32 %v1093_v32, %v1094_v58  ;;  %v1097_v22 = vsel %vm2891_vm1, %v1686_v39, -inf  ;;  %vm2892_vm15 = vcmp.gt.f32.partialorder %v2056_v46, 0.5  ;;  %vm2893_vm7 = vmmov %vm2891_vm1 }
  0x8b   : > { %v1079_v42 = vsel %vm2892_vm15, %v1690_v41, -inf  ;;  %v1201_v25 = vmax.f32 %v1053_v33, %v1054_v34  ;;  %v1033_v3 = vsel %vm2893_vm7, %v1768_v47, -inf  ;;  %vm2894_vm3 = vcmp.gt.f32.partialorder %v2287_v44, 0.5 }
  0x8c   : > { %v1098_v60 = vsel %vm2894_vm3, %v1688_v40, -inf  ;;  %vm2895_vm0 = vmmov %vm2894_vm3  ;;  %v2571_v46 = vsel %vm904_vm10, %v1696_v48, -inf  ;;  %v2573_v45 = vmax.f32 %v1251_v38, %v1095_v63  ;;  %vm2896_vm8 = vcmp.gt.f32.partialorder %v2311_v11, 0.5 }
  0x8d   : > { %1189 = vmax.xlane.f32.xlu1 %v1188_v6  ;;  %v1034_v5 = vsel %vm2895_vm0, %v1770_v50, -inf  ;;  %v1099_v47 = vsel %vm2896_vm8, %v1690_v41, -inf  ;;  %vm2897_vm6 = vcmp.gt.f32.partialorder %v2092_v4, 0.5  ;;  %vm2898_vm12 = vcmp.gt.f32.partialorder %v2235_v1, 0.5  ;;  %vm2902_vm5 = vmmov %vm2896_vm8 }
  0x8e   : > { %v1080_v6 = vsel %vm2897_vm6, %v1696_v48, -inf  ;;  %v1055_v30 = vsel %vm2898_vm12, %v1731_v16, -inf  ;;  %v1256_v50 = vmax.f32 %v1097_v22, %v1098_v60  ;;  %v1238_v61 = vmax.f32 %v1237_v29, %v1084_v55  ;;  %vm2909_vm8 = vmmov %vm2898_vm12 }
  0x8f   : > { %v1232_v31 = vmax.f32 %v1231_v0, %v1079_v42  ;;  %v1253_v62 = vmax.f32 %v2573_v45, %v2571_v46  ;;  %vm2899_vm2 = vcmp.gt.f32.partialorder %v2344_v23, 0.5  ;;  %v1176_v4 = vmax.f32 %v1033_v3, %v1034_v5 }
  0x90   : > { %1199 = vmax.xlane.f32.xlu2 %v1198_v24  ;;  %v2563_v37 = vpop.xlane.xlu2 %531  ;;  %v2589_v2 = vsel %vm2899_vm2, %v1696_v48, -inf  ;;  %vm2900_vm14 = vcmp.gt.f32.partialorder %v2127_v12, 0.5  ;;  %vm2901_vm13 = vcmp.gt.f32.partialorder %v2143_v10, 0.5  ;;  %v2599_v27 = vmax.f32 %v1256_v50, %v1099_v47  ;;  %vm2906_vm15 = vmmov %vm2899_vm2 }
  0x91   : > { %v1057_v26 = vsel %vm2900_vm14, %v1727_v14, -inf  ;;  %v1058_v17 = vsel %vm2901_vm13, %v1729_v15, -inf  ;;  %v1202_v35 = vmax.f32 %v1201_v25, %v1055_v30  ;;  %v1035_v24 = vsel %vm2902_vm5, %v1772_v51, -inf  ;;  %vm2912_vm2 = vmmov %vm2902_vm5 }
  0x92   : > { %1224 = vmax.xlane.f32.xlu0 %v1223_v28  ;;  %vm2903_vm4 = vcmp.gt.f32.partialorder %v2270_v20, 0.5  ;;  %vm2904_vm11 = vcmp.gt.f32.partialorder %v2206_v53, 0.5  ;;  %vm2905_vm1 = vcmp.gt.f32.partialorder %v2211_v54, 0.5  ;;  %v1233_v33 = vmax.f32 %v1232_v31, %v1080_v6  ;;  %vm2915_vm13 = vmmov %vm2906_vm15 }
  0x93   : > { %v2591_v8 = vpop.xlane.xlu0 %422  ;;  %v1056_v55 = vsel %vm2903_vm4, %v1733_v18, -inf  ;;  %v1085_v12 = vsel %vm2904_vm11, %v1686_v39, -inf  ;;  %v1086_v10 = vsel %vm2905_vm1, %v1688_v40, -inf  ;;  %v1206_v34 = vmax.f32 %v1057_v26, %v1058_v17  ;;  %vm2913_vm14 = vmmov %vm2903_vm4 }
  0x94   : > { %v1036_v51 = vsel %vm2906_vm15, %v1774_v52, -inf  ;;  %v1177_v29 = vmax.f32 %v1176_v4, %v1035_v24  ;;  %vm2907_vm7 = vcmp.gt.f32.partialorder %v2154_v13, 0.5  ;;  %v1203_v39 = vmax.f32 %v1202_v35, %v1056_v55 }
  0x95   : > { %1229 = vmax.xlane.f32.xlu1 %v1228_v56  ;;  %v547_v28 = vpop.xlane.xlu1 %546  ;;  %v1258_v56 = vmax.f32 %v2599_v27, %v2589_v2  ;;  %v1059_v53 = vsel %vm2907_vm7, %v1731_v16, -inf  ;;  %v1241_v54 = vmax.f32 %v1085_v12, %v1086_v10  ;;  %vm2908_vm3 = vcmp.gt.f32.partialorder %v2282_v43, 0.5 }
  0x96   : > { %v1065_v40 = vsel %vm2908_vm3, %v1727_v14, -inf  ;;  %v1066_v32 = vsel %vm2895_vm0, %v1729_v15, -inf  ;;  %v1087_v52 = vsel %vm2909_vm8, %v1690_v41, -inf  ;;  %vm2910_vm6 = vcmp.gt.f32.partialorder %v2184_v36, 0.5 }
  0x97   : > { %v1060_v13 = vsel %vm2910_vm6, %v1733_v18, -inf  ;;  %v1207_v58 = vmax.f32 %v1206_v34, %v1059_v53  ;;  %v1178_v38 = vmax.f32 %v1177_v29, %v1036_v51  ;;  %v1061_v43 = vsel %vm901_vm9, %v1727_v14, -inf }
  0x98   : > { %1239 = vmax.xlane.f32.xlu2 %v1238_v61  ;;  %v2621_v0 = vpop.xlane.xlu2 %695  ;;  %vm2911_vm12 = vcmp.gt.f32.partialorder %v2259_v59, 0.5  ;;  %v1216_v22 = vmax.f32 %v1065_v40, %v1066_v32  ;;  %v1242_v41 = vmax.f32 %v1241_v54, %v1087_v52  ;;  %v1067_v36 = vsel %vm2912_vm2, %v1731_v16, -inf }
  0x99   : > { %v1062_v44 = vsel %vm2911_vm12, %v1729_v15, -inf  ;;  %v552_v1 = vlaneseq  ;;  %v1088_v42 = vsel %vm2913_vm14, %v1696_v48, -inf  ;;  %v1208_v21 = vmax.f32 %v1207_v58, %v1060_v13 }
  0x9a   : > { %1234 = vmax.xlane.f32.xlu0 %v1233_v33  ;;  %v1211_v14 = vmax.f32 %v1061_v43, %v1062_v44  ;;  %vm2914_vm9 = vcmp.gt.f32.partialorder %v2298_v57, 0.5  ;;  %v1217_v59 = vmax.f32 %v1216_v22, %v1067_v36  ;;  %v1243_v3 = vmax.f32 %v1242_v41, %v1088_v42 }
  0x9b   : > { %v542_v63 = vpop.xlane.xlu0 %541  ;;  %v1063_v15 = vsel %vm2914_vm9, %v1731_v16, -inf  ;;  %v1068_v11 = vsel %vm2915_vm13, %v1733_v18, -inf  ;;  %v2653_v60 = vand.u32 127, %v552_v1  ;;  %v1064_v16 = vsel %vm904_vm10, %v1733_v18, -inf }
  0x9c   : > { %v1212_v20 = vmax.f32 %v1211_v14, %v1063_v15  ;;  %v1218_v47 = vmax.f32 %v1217_v59, %v1068_v11  ;;  %vm562_vm5 = vcmask 60416   ;;  %vm2916_vm4 = vcmask 1041409  }
  0x9d   : > { %1204 = vmax.xlane.f32.xlu1 %v1203_v39  ;;  %v554_v5 = vperm.slane %v2563_v37, %v2653_v60  ;;  %v556_v23 = vperm.slane %v542_v63, %v2653_v60  ;;  %v557_v6 = vperm.slane %v547_v28, %v2653_v60  ;;  %vm2917_vm11 = vcmask 1042434   ;;  %vm2919_vm1 = vmmov %vm2916_vm4 }
  0x9e   : > { %v1213_v18 = vmax.f32 %v1212_v20, %v1064_v16  ;;  %vm2918_vm10 = vcmask 1043459   ;;  %vm462_vm15 = vcmask 3072   ;;  %vm2920_vm7 = vmmov %vm2917_vm11  ;;  %v2691_v49 = vadd.s32 4294967288, %v2653_v60 }
  0x9f   : > { %v441_v25 = vpop.xlane.xlu1 %440  ;;  %vm2921_vm3 = vmmov %vm2918_vm10  ;;  %vm808_vm0 = vcmask 130112   ;;  %v805_v39 = vperm.slane %v2621_v0, %v2653_v60  ;;  %v2704_v54 = vadd.s32 4294967272, %v2653_v60  ;;  %vm812_vm8 = vcmask 195712  }
  0xa0   : > { %1179 = vmax.xlane.f32.xlu2 %v1178_v38  ;;  %v457_v31 = vrot.slane %v441_v25, 6  ;;  %vm816_vm6 = vcmask 261312   ;;  %vm2922_vm12 = vmmov %vm2919_vm1  ;;  %vm843_vm2 = vcmask 216064   ;;  %vm1302_vm13 = vcmask 326912  }
  0xa1   : > { %vm2923_vm14 = vmmov %vm2920_vm7 }
  0xa2   : > { %1209 = vmax.xlane.f32.xlu0 %v1208_v21  ;;  %vm2924_vm9 = vmmov %vm2921_vm3 }
  0xa3   : > { %v537_v48 = vpop.xlane.xlu2 %536 }
  0xa4   : > { %v555_v57 = vperm.slane %v537_v48, %v2653_v60 }
  0xa5   : > { %1244 = vmax.xlane.f32.xlu1 %v1243_v3  ;;  %v432_v30 = vpop.xlane.xlu0 %431 }
  0xa6   : > { %v558_v37 = vsel %vm2916_vm4, %v555_v57, %v554_v5  ;;  %v455_v61 = vrot.slane %v432_v30, 7  ;;  %vm1310_vm4 = vcmask 458112  }
  0xa7   : > { %v559_v50 = vsel %vm2917_vm11, %v556_v23, %v558_v37  ;;  %v450_v19 = vpop.xlane.xlu1 %449  ;;  %vm1314_vm11 = vcmask 523712  }
  0xa8   : > { %v560_v4 = vsel %vm2918_vm10, %v557_v6, %v559_v50  ;;  %v459_v26 = vrot.slane %v450_v19, 5  ;;  %1219 = vmax.xlane.f32.xlu2 %v1218_v47  ;;  %v456_v17 = vsel %vm2919_vm1, %v455_v61, %v2591_v8  ;;  %vm2925_vm10 = vmmov %vm2919_vm1  ;;  %vm1365_vm1 = vcmask 519168  }
  0xa9   : > { %563 = vst.msk [vmem:[%s326_s19] sm:$0xf] %vm562_vm5, %v560_v4  ;;  %v458_v35 = vsel %vm2920_vm7, %v457_v31, %v456_v17  ;;  %v2743_v4 = vadd.s32 4294967264, %v2653_v60  ;;  %vm1306_vm5 = vcmask 392512  }
  0xaa   : > { %v460_v24 = vsel %vm2921_vm3, %v459_v26, %v458_v35  ;;  %1214 = vmax.xlane.f32.xlu0 %v1213_v18 }
  0xab   : > { %v716_v28 = vpop.xlane.xlu2 %715  ;;  %463 = vst.msk [vmem:[%s322_s22] sm:$0xf] %vm462_vm15, %v460_v24  ;;  %vm2926_vm15 = vmmov %vm2920_vm7 }
  0xac   : > { %v815_v22 = vperm.slane %v716_v28, %v2704_v54  ;;  %vm2927_vm7 = vmmov %vm2921_vm3 }
  0xad   : > { %1249 = vmax.xlane.f32.xlu1 %v1248_v7  ;;  %v701_v55 = vpop.xlane.xlu0 %700  ;;  %v2694_v7 = vadd.s32 4294967280, %v2653_v60 }
  0xae   : > { %v807_v46 = vperm.slane %v701_v55, %v2691_v49 }
  0xb0   : > { %v706_v12 = vpop.xlane.xlu1 %705  ;;  %v809_v58 = vsel %vm808_vm0, %v807_v46, %v805_v39 }
  0xb1   : > { %v811_v32 = vperm.slane %v706_v12, %v2694_v7 }
  0xb2   : > { %1254 = vmax.xlane.f32.xlu0 %v1253_v62 }
  0xb3   : > { %v731_v8 = vpop.xlane.xlu2 %730  ;;  %v813_v1 = vsel %vm812_vm8, %v811_v32, %v809_v58 }
  0xb4   : > { %v821_v52 = vperm.slane %v731_v8, %v2694_v7  ;;  %v817_v48 = vsel %vm816_vm6, %v815_v22, %v813_v1  ;;  %v1304_v1 = vadd.s32 4294967256, %v2653_v60 }
  0xb5   : > { %1259 = vmax.xlane.f32.xlu1 %v1258_v56  ;;  %v721_v10 = vpop.xlane.xlu0 %720 }
  0xb6   : > { %v818_v45 = vperm.slane %v721_v10, %v2653_v60 }
  0xb8   : > { %v726_v33 = vpop.xlane.xlu1 %725 }
  0xb9   : > { %v819_v62 = vperm.slane %v726_v33, %v2691_v49 }
  0xbb   : > { %v750_v34 = vpop.xlane.xlu2 %749  ;;  %v820_v63 = vsel %vm808_vm0, %v819_v62, %v818_v45 }
  0xbc   : > { %v826_v27 = vperm.slane %v750_v34, %v2691_v49  ;;  %v822_v42 = vsel %vm812_vm8, %v821_v52, %v820_v63 }
  0xbd   : > { %v740_v51 = vpop.xlane.xlu0 %739 }
  0xbe   : > { %v823_v38 = vperm.slane %v740_v51, %v2704_v54 }
  0xc0   : > { %v745_v29 = vpop.xlane.xlu1 %744  ;;  %v824_v21 = vsel %vm816_vm6, %v823_v38, %v822_v42 }
  0xc1   : > { %v825_v56 = vperm.slane %v745_v29, %v2653_v60  ;;  %v839_v20 = vsel %vm2922_vm12, %v824_v21, %v817_v48 }
  0xc3   : > { %v769_v53 = vpop.xlane.xlu2 %768  ;;  %v827_v43 = vsel %vm808_vm0, %v826_v27, %v825_v56 }
  0xc4   : > { %v832_v0 = vperm.slane %v769_v53, %v2653_v60 }
  0xc5   : > { %v755_v9 = vpop.xlane.xlu0 %754 }
  0xc6   : > { %v828_v40 = vperm.slane %v755_v9, %v2694_v7 }
  0xc8   : > { %v764_v2 = vpop.xlane.xlu1 %763  ;;  %v829_v41 = vsel %vm812_vm8, %v828_v40, %v827_v43 }
  0xc9   : > { %v830_v44 = vperm.slane %v764_v2, %v2704_v54 }
  0xcb   : > { %v788_v13 = vpop.xlane.xlu2 %787  ;;  %v831_v59 = vsel %vm816_vm6, %v830_v44, %v829_v41 }
  0xcc   : > { %v837_v14 = vperm.slane %v788_v13, %v2704_v54  ;;  %v840_v16 = vsel %vm2923_vm14, %v831_v59, %v839_v20 }
  0xcd   : > { %v774_v36 = vpop.xlane.xlu0 %773 }
  0xce   : > { %v833_v25 = vperm.slane %v774_v36, %v2691_v49 }
  0xd0   : > { %v779_v15 = vpop.xlane.xlu1 %778  ;;  %v834_v3 = vsel %vm808_vm0, %v833_v25, %v832_v0  ;;  %v1308_v25 = vadd.s32 4294967248, %v2653_v60 }
  0xd1   : > { %v835_v11 = vperm.slane %v779_v15, %v2694_v7 }
  0xd3   : > { %v836_v5 = vsel %vm812_vm8, %v835_v11, %v834_v3  ;;  %v1115_v57 = vpop.xlane.xlu2 %1114 }
  0xd4   : > { %v838_v47 = vsel %vm816_vm6, %v837_v14, %v836_v5  ;;  %v1296_v30 = vperm.slane %v1115_v57, %v2694_v7 }
  0xd5   : > { %v841_v23 = vsel %vm2924_vm9, %v838_v47, %v840_v16  ;;  %v1105_v6 = vpop.xlane.xlu0 %1104 }
  0xd6   : > { %844 = vst.msk [vmem:[%s330_s25] sm:$0xf] %vm843_vm2, %v841_v23  ;;  %v1293_v37 = vperm.slane %v1105_v6, %v2653_v60  ;;  %v1312_v23 = vadd.s32 4294967240, %v2653_v60 }
  0xd8   : > { %v1110_v50 = vpop.xlane.xlu1 %1109 }
  0xd9   : > { %v1294_v61 = vperm.slane %v1110_v50, %v2691_v49 }
  0xdb   : > { %v1295_v19 = vsel %vm808_vm0, %v1294_v61, %v1293_v37  ;;  %v2739_v18 = vpop.xlane.xlu2 %1129 }
  0xdc   : > { %v1297_v31 = vsel %vm812_vm8, %v1296_v30, %v1295_v19  ;;  %v1305_v47 = vperm.slane %v2739_v18, %v1304_v1 }
  0xdd   : > { %v1120_v26 = vpop.xlane.xlu0 %1119 }
  0xde   : > { %v1298_v17 = vperm.slane %v1120_v26, %v2704_v54 }
  0xe0   : > { %v1125_v35 = vpop.xlane.xlu1 %1124  ;;  %v1299_v24 = vsel %vm816_vm6, %v1298_v17, %v1297_v31 }
  0xe1   : > { %v1301_v28 = vperm.slane %v1125_v35, %v2743_v4 }
  0xe3   : > { %v2749_v55 = vsel %vm1302_vm13, %v1301_v28, %v1299_v24  ;;  %v1145_v12 = vpop.xlane.xlu2 %1144 }
  0xe4   : > { %v1316_v52 = vperm.slane %v1145_v12, %v2653_v60 }
  0xe5   : > { %v2751_v8 = vpop.xlane.xlu0 %1134 }
  0xe6   : > { %v1309_v30 = vperm.slane %v2751_v8, %v1308_v25 }
  0xe8   : > { %v2753_v10 = vpop.xlane.xlu1 %1139 }
  0xeb   : > { %v1160_v33 = vpop.xlane.xlu2 %1159 }
  0xec   : > { %v1321_v0 = vperm.slane %v1160_v33, %v2704_v54  ;;  %v1307_v33 = vsel %vm1306_vm5, %v1305_v47, %v2749_v55 }
  0xed   : > { %v1150_v34 = vpop.xlane.xlu0 %1149 }
  0xee   : > { %v1317_v13 = vperm.slane %v1150_v34, %v2691_v49  ;;  %v1313_v34 = vperm.slane %v2753_v10, %v1312_v23 }
  0xf0   : > { %v1155_v51 = vpop.xlane.xlu1 %1154  ;;  %v1318_v38 = vsel %vm808_vm0, %v1317_v13, %v1316_v52 }
  0xf1   : > { %v1319_v58 = vperm.slane %v1155_v51, %v2694_v7 }
  0xf3   : > { %v2755_v29 = vpop.xlane.xlu2 %1174  ;;  %v1320_v22 = vsel %vm812_vm8, %v1319_v58, %v1318_v38 }
  0xf4   : > { %v1322_v21 = vsel %vm816_vm6, %v1321_v0, %v1320_v22  ;;  %v1327_v50 = vperm.slane %v2755_v29, %v1308_v25 }
  0xf5   : > { %v1165_v53 = vpop.xlane.xlu0 %1164 }
  0xf6   : > { %v1323_v42 = vperm.slane %v1165_v53, %v2743_v4 }
  0xf8   : > { %v1170_v9 = vpop.xlane.xlu1 %1169  ;;  %v1324_v5 = vsel %vm1302_vm13, %v1323_v42, %v1322_v21 }
  0xf9   : > { %v1325_v14 = vperm.slane %v1170_v9, %v1304_v1 }
  0xfb   : > { %v1195_v46 = vpop.xlane.xlu2 %1194  ;;  %v1326_v31 = vsel %vm1306_vm5, %v1325_v14, %v1324_v5 }
  0xfc   : > { %v1334_v15 = vperm.slane %v1195_v46, %v2694_v7  ;;  %v1328_v29 = vsel %vm1310_vm4, %v1327_v50, %v1326_v31 }
  0xfd   : > { %v1185_v45 = vpop.xlane.xlu0 %1184 }
  0xfe   : > { %v1331_v41 = vperm.slane %v1185_v45, %v2653_v60 }
 0x100   : > { %v1190_v62 = vpop.xlane.xlu1 %1189 }
 0x101   : > { %v1332_v36 = vperm.slane %v1190_v62, %v2691_v49 }
 0x103   : > { %v1200_v2 = vpop.xlane.xlu2 %1199  ;;  %v1333_v59 = vsel %vm808_vm0, %v1332_v36, %v1331_v41 }
 0x104   : > { %v1336_v3 = vperm.slane %v1200_v2, %v2704_v54 }
 0x105   : > { %v1225_v27 = vpop.xlane.xlu0 %1224 }
 0x106   : > { %v1346_v11 = vperm.slane %v1225_v27, %v2653_v60 }
 0x108   : > { %v1230_v56 = vpop.xlane.xlu1 %1229 }
 0x109   : > { %v1347_v48 = vperm.slane %v1230_v56, %v2691_v49  ;;  %v1335_v49 = vsel %vm812_vm8, %v1334_v15, %v1333_v59 }
 0x10b   : > { %v1240_v40 = vpop.xlane.xlu2 %1239  ;;  %v1348_v26 = vsel %vm808_vm0, %v1347_v48, %v1346_v11 }
 0x10c   : > { %v1351_v18 = vperm.slane %v1240_v40, %v2704_v54  ;;  %v1311_v54 = vsel %vm1310_vm4, %v1309_v30, %v1307_v33 }
 0x10d   : > { %v1235_v39 = vpop.xlane.xlu0 %1234  ;;  %v1315_v2 = vsel %vm1314_vm11, %v1313_v34, %v1311_v54 }
 0x10e   : > { %v1349_v57 = vperm.slane %v1235_v39, %v2694_v7  ;;  %v1337_v7 = vsel %vm816_vm6, %v1336_v3, %v1335_v49 }
 0x110   : > { %v1205_v32 = vpop.xlane.xlu1 %1204  ;;  %v1350_v60 = vsel %vm812_vm8, %v1349_v57, %v1348_v26 }
 0x111   : > { %v1338_v16 = vperm.slane %v1205_v32, %v2743_v4  ;;  %v1352_v53 = vsel %vm816_vm6, %v1351_v18, %v1350_v60 }
 0x113   : > { %v1180_v44 = vpop.xlane.xlu2 %1179  ;;  %v1339_v17 = vsel %vm1302_vm13, %v1338_v16, %v1337_v7 }
 0x114   : > { %v1329_v35 = vperm.slane %v1180_v44, %v1312_v23 }
 0x115   : > { %v1210_v63 = vpop.xlane.xlu0 %1209 }
 0x116   : > { %v1340_v6 = vperm.slane %v1210_v63, %v1304_v1  ;;  %v1330_v9 = vsel %vm1314_vm11, %v1329_v35, %v1328_v29 }
 0x117   : > { %v1361_v39 = vsel %vm2925_vm10, %v1330_v9, %v1315_v2 }
 0x118   : > { %v1245_v43 = vpop.xlane.xlu1 %1244  ;;  %v1341_v28 = vsel %vm1306_vm5, %v1340_v6, %v1339_v17 }
 0x119   : > { %v1353_v24 = vperm.slane %v1245_v43, %v2743_v4 }
 0x11b   : > { %v1220_v19 = vpop.xlane.xlu2 %1219  ;;  %v1354_v46 = vsel %vm1302_vm13, %v1353_v24, %v1352_v53 }
 0x11c   : > { %v1344_v8 = vperm.slane %v1220_v19, %v1312_v23 }
 0x11d   : > { %v1215_v20 = vpop.xlane.xlu0 %1214 }
 0x11e   : > { %v1342_v61 = vperm.slane %v1215_v20, %v1308_v25 }
 0x120   : > { %v1250_v37 = vpop.xlane.xlu1 %1249  ;;  %v1343_v51 = vsel %vm1310_vm4, %v1342_v61, %v1341_v28 }
 0x121   : > { %v1355_v12 = vperm.slane %v1250_v37, %v1304_v1  ;;  %v1345_v10 = vsel %vm1314_vm11, %v1344_v8, %v1343_v51 }
 0x122   : > { %v1362_v40 = vsel %vm2926_vm15, %v1345_v10, %v1361_v39 }
 0x123   : > { %v1356_v55 = vsel %vm1306_vm5, %v1355_v12, %v1354_v46 }
 0x125   : > { %v1255_v4 = vpop.xlane.xlu0 %1254 }
 0x126   : > { %v1357_v45 = vperm.slane %v1255_v4, %v1308_v25 }
 0x128   : > { %v1260_v62 = vpop.xlane.xlu1 %1259  ;;  %v1358_v27 = vsel %vm1310_vm4, %v1357_v45, %v1356_v55 }
 0x129   : > { %v1359_v56 = vperm.slane %v1260_v62, %v1312_v23 }
 0x12b   : > { %v1360_v32 = vsel %vm1314_vm11, %v1359_v56, %v1358_v27 }
 0x12c   : > { %v1363_v52 = vsel %vm2927_vm7, %v1360_v32, %v1362_v40 }
 0x12d   : > { %1366 = vst.msk [vmem:[%s334_s30] sm:$0xf] %vm1365_vm1, %v1363_v52 }
 0x12e PF: > { %s19_s27 = sadd.s32 1, %s1541_s27  }
 0x12f   : > { %p16_p4 = scmp.ge.s32.totalorder %s19_s27, 4  }
 0x131   :  { %18 = sbr.rel (!%p16_p4) target bundleno = 1 (0x1), region = 106 }

</bundles_post_ra>
